<compile_context>
chip_gen: v7x
topology: tpu7x:2x2x1
jax: 0.10.0
libtpu: 0.0.40
codegen_flags: <defaults>
</compile_context>

<pallas_src>
import numpy as np
import jax
import jax.numpy as jnp
from jax.experimental import pallas as pl
from jax.experimental.pallas import tpu as pltpu

IMG_SHAPE = (1, 28, 28)
IMG_FLAT = int(np.prod(IMG_SHAPE))      # 784
N_CLASSES = 10
LAB_PAD = 16                            # label features zero-padded 10 -> 16
HIDDEN = 512
LATENT = 100
LATENT_PAD = 128                        # latent features zero-padded 100 -> 128
HEADS_PAD = 2 * LATENT_PAD              # merged [mu | logvar] head width = 256
DROPOUT_P = 0.4
KEEP = 1.0 - DROPOUT_P


def _round_up(x, m):
    return (x + m - 1) // m * m


def _make_kernel(batch, tile_b):
    def kernel(img_ref, lab_ref, eps_ref, m2_ref, m3_ref,
               w1i_ref, w1l_ref, b1_ref, w2_ref, b2_ref, w3_ref, b3_ref,
               wh_ref, bh_ref,
               z_ref, kl_ref):
        # ---- Layer 1: Linear(784+10 -> 512) as two bf16 dots + LeakyReLU(0.2).
        h = (jnp.dot(img_ref[...], w1i_ref[...],
                     preferred_element_type=jnp.float32)
             + jnp.dot(lab_ref[...], w1l_ref[...],
                       preferred_element_type=jnp.float32)
             + b1_ref[...])
        h = jnp.maximum(h, 0.2 * h)

        # ---- Layer 2: Linear(512->512) + Dropout(0.4) + LeakyReLU(0.2).
        # The 1/keep rescale is folded into w3, so only the {0,1} mask is applied.
        h = jnp.dot(h.astype(jnp.bfloat16), w2_ref[...],
                    preferred_element_type=jnp.float32) + b2_ref[...]
        h = h * m2_ref[...].astype(jnp.float32)
        h = jnp.maximum(h, 0.2 * h)

        # ---- Layer 3: Linear(512->512) + Dropout(0.4) + LeakyReLU(0.2).
        # The 1/keep rescale is folded into the merged head weights.
        h = jnp.dot(h.astype(jnp.bfloat16), w3_ref[...],
                    preferred_element_type=jnp.float32) + b3_ref[...]
        h = h * m3_ref[...].astype(jnp.float32)
        h = jnp.maximum(h, 0.2 * h)

        # ---- Merged heads: one (512, 256) dot -> [mu(128) | logvar(128)].
        heads = jnp.dot(h.astype(jnp.bfloat16), wh_ref[...],
                        preferred_element_type=jnp.float32) + bh_ref[...]
        mu = heads[:, :LATENT_PAD]           # vreg-aligned slices: free
        logvar = heads[:, LATENT_PAD:]

        # ---- Reparameterize: z = mu + exp(logvar/2) * eps.
        std = jnp.exp(0.5 * logvar)
        z_ref[...] = mu + std * eps_ref[...]

        # ---- KL partial: lane-dense (1, 128) per tile, rows reduced in-kernel.
        # Padded latent lanes give (1 + 0 - 0 - 1) = 0; padded batch rows are
        # masked, so the wrapper-side scalar sum is exact. std is reused.
        var = std * std
        row = (pl.program_id(0) * tile_b
               + jax.lax.broadcasted_iota(jnp.int32, (tile_b, 1), 0))
        valid = (row < batch).astype(jnp.float32)
        terms = valid * (1.0 + logvar - mu * mu - var)
        kl_ref[...] = jnp.sum(terms, axis=0, keepdims=True).reshape(
            1, 1, LATENT_PAD)

    return kernel


def _const_spec(a):
    nd = a.ndim
    return pl.BlockSpec(a.shape, lambda i, _nd=nd: (0,) * _nd)


def encoder_forward(img, label_embedding, params, eps, dropout_rng, train=True):
    """img: (B,1,28,28) float (bf16 preferred), label_embedding: (B,10),
    eps: (B,100) f32 reparameterization noise, dropout_rng: jax PRNG key."""
    B = img.shape[0]
    img_flat = img.reshape(B, IMG_FLAT).astype(jnp.bfloat16)
    lab = jnp.pad(label_embedding,
                  ((0, 0), (0, LAB_PAD - N_CLASSES))).astype(jnp.bfloat16)
    eps_p = jnp.pad(eps.astype(jnp.float32),
                    ((0, 0), (0, LATENT_PAD - LATENT)))

    if train:
        k2, k3 = jax.random.split(dropout_rng)
        m2 = jax.random.bernoulli(k2, KEEP, (B, HIDDEN)).astype(jnp.bfloat16)
        m3 = jax.random.bernoulli(k3, KEEP, (B, HIDDEN)).astype(jnp.bfloat16)
    else:
        # Eval / inference: dropout is identity. Since 1/keep is folded into the
        # downstream weights, a constant `keep`-valued mask cancels it exactly.
        m2 = jnp.full((B, HIDDEN), KEEP, jnp.float32)
        m3 = jnp.full((B, HIDDEN), KEEP, jnp.float32)

    # Batch tiling: up to 256 rows per grid step (multiple of 8).
    tile_b = min(256, _round_up(B, 8))
    Bp = _round_up(B, tile_b)
    if Bp != B:
        pad = ((0, Bp - B), (0, 0))
        img_flat = jnp.pad(img_flat, pad)
        lab = jnp.pad(lab, pad)
        eps_p = jnp.pad(eps_p, pad)
        m2 = jnp.pad(m2, pad)
        m3 = jnp.pad(m3, pad)
    n_tiles = Bp // tile_b

    weights = (params["w1_img"], params["w1_lab"], params["b1"],
               params["w2"], params["b2"],
               params["w3"], params["b3"],
               params["w_heads"], params["b_heads"])
    inputs = (img_flat, lab, eps_p, m2, m3) + weights

    batched = lambda cols: pl.BlockSpec((tile_b, cols), lambda i: (i, 0))
    in_specs = [batched(IMG_FLAT), batched(LAB_PAD), batched(LATENT_PAD),
                batched(HIDDEN), batched(HIDDEN)]
    in_specs += [_const_spec(a) for a in weights]

    out_shapes = (jax.ShapeDtypeStruct((Bp, LATENT_PAD), jnp.float32),
                  jax.ShapeDtypeStruct((n_tiles, 1, LATENT_PAD), jnp.float32))
    out_specs = (pl.BlockSpec((tile_b, LATENT_PAD), lambda i: (i, 0)),
                 pl.BlockSpec((1, 1, LATENT_PAD), lambda i: (i, 0, 0)))

    z_pad, kl_part = pl.pallas_call(
        _make_kernel(B, tile_b),
        out_shape=out_shapes,
        grid=(n_tiles,),
        in_specs=in_specs,
        out_specs=out_specs,
        compiler_params=pltpu.CompilerParams(
            dimension_semantics=("parallel",)),
    )(*inputs)

    z = z_pad[:B, :LATENT]
    kl = -0.5 * jnp.sum(kl_part)
    return z, kl


def init_params(key):
    """PyTorch-style Linear init U(-1/sqrt(fan_in), 1/sqrt(fan_in)).
    Weights stored in bfloat16 (matmuls accumulate in f32); biases in f32.
    The Dropout 1/keep rescales are folded into w3 and the merged head weight
    (exact: LeakyReLU(0.2) is positively homogeneous)."""
    def linear(k, fan_in, fan_out):
        k1, k2 = jax.random.split(k)
        bound = 1.0 / np.sqrt(fan_in)
        w = jax.random.uniform(k1, (fan_in, fan_out), jnp.float32, -bound, bound)
        b = jax.random.uniform(k2, (1, fan_out), jnp.float32, -bound, bound)
        return w, b

    k1, k2, k3, k4, k5 = jax.random.split(key, 5)
    inv_keep = np.float32(1.0 / KEEP)

    in_dim = IMG_FLAT + N_CLASSES
    w1, b1 = linear(k1, in_dim, HIDDEN)
    w1_img = w1[:IMG_FLAT]
    w1_lab = jnp.pad(w1[IMG_FLAT:], ((0, LAB_PAD - N_CLASSES), (0, 0)))

    w2, b2 = linear(k2, HIDDEN, HIDDEN)
    w3, b3 = linear(k3, HIDDEN, HIDDEN)
    w3 = w3 * inv_keep                      # fold dropout-1's 1/keep

    wmu, bmu = linear(k4, HIDDEN, LATENT)
    wlv, blv = linear(k5, HIDDEN, LATENT)
    pad_out = ((0, 0), (0, LATENT_PAD - LATENT))
    wmu = jnp.pad(wmu * inv_keep, pad_out)  # fold dropout-2's 1/keep
    wlv = jnp.pad(wlv * inv_keep, pad_out)
    bmu = jnp.pad(bmu, pad_out)
    blv = jnp.pad(blv, pad_out)
    w_heads = jnp.concatenate([wmu, wlv], axis=1)   # (512, 256): [mu | logvar]
    b_heads = jnp.concatenate([bmu, blv], axis=1)   # (1, 256)

    bf = lambda w: w.astype(jnp.bfloat16)
    return dict(w1_img=bf(w1_img), w1_lab=bf(w1_lab), b1=b1,
                w2=bf(w2), b2=b2, w3=bf(w3), b3=b3,
                w_heads=bf(w_heads), b_heads=b_heads)


if __name__ == "__main__":
    key = jax.random.PRNGKey(0)
    k_par, k_img, k_lab, k_eps, k_drop = jax.random.split(key, 5)

    B = 8
    params = init_params(k_par)

    # Inputs produced directly in bf16 (halves image DMA; the wrapper accepts
    # any float dtype and adds no extra round trip when it is already bf16).
    img = jax.random.normal(k_img, (B,) + IMG_SHAPE, jnp.float32).astype(jnp.bfloat16)
    label_embedding = jax.random.normal(k_lab, (B, N_CLASSES),
                                        jnp.float32).astype(jnp.bfloat16)

    # Stochastic pieces made deterministic: reparameterization noise `eps` and
    # the dropout keep-masks (derived from `k_drop` in the wrapper) are explicit
    # inputs, so the kernel itself is fully deterministic and portable.
    eps = jax.random.normal(k_eps, (B, LATENT), jnp.float32)

    z, kl = encoder_forward(img, label_embedding, params, eps, k_drop, train=True)
    jax.block_until_ready((z, kl))

    assert z.shape == (B, LATENT)
    assert bool(jnp.all(jnp.isfinite(z))) and bool(jnp.isfinite(kl))
    print("KERNEL_OK")
</pallas_src>

<mosaic_0001>
module attributes {stable_mosaic.version = 11 : i64} {
  func.func @kernel(%arg0: i32, %arg1: memref<8x784xbf16, #tpu.memory_space<vmem>>, %arg2: memref<8x16xbf16, #tpu.memory_space<vmem>>, %arg3: memref<8x128xf32, #tpu.memory_space<vmem>>, %arg4: memref<8x512xbf16, #tpu.memory_space<vmem>>, %arg5: memref<8x512xbf16, #tpu.memory_space<vmem>>, %arg6: memref<784x512xbf16, #tpu.memory_space<vmem>>, %arg7: memref<16x512xbf16, #tpu.memory_space<vmem>>, %arg8: memref<1x512xf32, #tpu.memory_space<vmem>>, %arg9: memref<512x512xbf16, #tpu.memory_space<vmem>>, %arg10: memref<1x512xf32, #tpu.memory_space<vmem>>, %arg11: memref<512x512xbf16, #tpu.memory_space<vmem>>, %arg12: memref<1x512xf32, #tpu.memory_space<vmem>>, %arg13: memref<512x256xbf16, #tpu.memory_space<vmem>>, %arg14: memref<1x256xf32, #tpu.memory_space<vmem>>, %arg15: memref<8x128xf32, #tpu.memory_space<vmem>>, %arg16: memref<1x1x128xf32, #tpu.memory_space<vmem>>) attributes {dimension_semantics = [#tpu.dimension_semantics<parallel>], iteration_bounds = array<i64: 1>, scalar_prefetch = 0 : i64, scratch_operands = 0 : i64, tpu.core_type = #tpu.core_type<tc>, window_params = [{transform_indices = @transform_0, window_bounds = array<i64: 8, 784>}, {transform_indices = @transform_1, window_bounds = array<i64: 8, 16>}, {transform_indices = @transform_2, window_bounds = array<i64: 8, 128>}, {transform_indices = @transform_3, window_bounds = array<i64: 8, 512>}, {transform_indices = @transform_4, window_bounds = array<i64: 8, 512>}, {pipeline_mode = #tpu.pipeline_mode<synchronous>, transform_indices = @transform_5, window_bounds = array<i64: 784, 512>}, {pipeline_mode = #tpu.pipeline_mode<synchronous>, transform_indices = @transform_6, window_bounds = array<i64: 16, 512>}, {pipeline_mode = #tpu.pipeline_mode<synchronous>, transform_indices = @transform_7, window_bounds = array<i64: 1, 512>}, {pipeline_mode = #tpu.pipeline_mode<synchronous>, transform_indices = @transform_8, window_bounds = array<i64: 512, 512>}, {pipeline_mode = #tpu.pipeline_mode<synchronous>, transform_indices = @transform_9, window_bounds = array<i64: 1, 512>}, {pipeline_mode = #tpu.pipeline_mode<synchronous>, transform_indices = @transform_10, window_bounds = array<i64: 512, 512>}, {pipeline_mode = #tpu.pipeline_mode<synchronous>, transform_indices = @transform_11, window_bounds = array<i64: 1, 512>}, {pipeline_mode = #tpu.pipeline_mode<synchronous>, transform_indices = @transform_12, window_bounds = array<i64: 512, 256>}, {pipeline_mode = #tpu.pipeline_mode<synchronous>, transform_indices = @transform_13, window_bounds = array<i64: 1, 256>}, {transform_indices = @transform_14, window_bounds = array<i64: 8, 128>}, {transform_indices = @transform_15, window_bounds = array<i64: 1, 1, 128>}]} {
    %c0 = arith.constant 0 : index
    %c0_0 = arith.constant 0 : index
    %0 = vector.load %arg1[%c0, %c0_0] : memref<8x784xbf16, #tpu.memory_space<vmem>>, vector<8x784xbf16>
    %c0_1 = arith.constant 0 : index
    %c0_2 = arith.constant 0 : index
    %1 = vector.load %arg6[%c0_1, %c0_2] : memref<784x512xbf16, #tpu.memory_space<vmem>>, vector<784x512xbf16>
    %cst = arith.constant dense<0.000000e+00> : vector<8x512xf32>
    %2 = tpu.matmul %0, %1, %cst {dimension_numbers = #tpu.dot_dimension_numbers<[1], [0], [0], [1], [0, 0, 1, 1], [], []>} : vector<8x784xbf16>, vector<784x512xbf16>, vector<8x512xf32> -> vector<8x512xf32>
    %c0_3 = arith.constant 0 : index
    %c0_4 = arith.constant 0 : index
    %3 = vector.load %arg2[%c0_3, %c0_4] : memref<8x16xbf16, #tpu.memory_space<vmem>>, vector<8x16xbf16>
    %c0_5 = arith.constant 0 : index
    %c0_6 = arith.constant 0 : index
    %4 = vector.load %arg7[%c0_5, %c0_6] : memref<16x512xbf16, #tpu.memory_space<vmem>>, vector<16x512xbf16>
    %cst_7 = arith.constant dense<0.000000e+00> : vector<8x512xf32>
    %5 = tpu.matmul %3, %4, %cst_7 {dimension_numbers = #tpu.dot_dimension_numbers<[1], [0], [0], [1], [0, 0, 1, 1], [], []>} : vector<8x16xbf16>, vector<16x512xbf16>, vector<8x512xf32> -> vector<8x512xf32>
    %6 = arith.addf %2, %5 : vector<8x512xf32>
    %c0_8 = arith.constant 0 : index
    %c0_9 = arith.constant 0 : index
    %7 = vector.load %arg8[%c0_8, %c0_9] : memref<1x512xf32, #tpu.memory_space<vmem>>, vector<1x512xf32>
    %8 = vector.broadcast %7 : vector<1x512xf32> to vector<8x512xf32>
    %9 = arith.addf %6, %8 : vector<8x512xf32>
    %cst_10 = arith.constant 2.000000e-01 : f32
    %10 = vector.broadcast %cst_10 : f32 to vector<8x512xf32>
    %11 = arith.mulf %10, %9 : vector<8x512xf32>
    %12 = arith.maximumf %9, %11 : vector<8x512xf32>
    %13 = arith.truncf %12 : vector<8x512xf32> to vector<8x512xbf16>
    %c0_11 = arith.constant 0 : index
    %c0_12 = arith.constant 0 : index
    %14 = vector.load %arg9[%c0_11, %c0_12] : memref<512x512xbf16, #tpu.memory_space<vmem>>, vector<512x512xbf16>
    %cst_13 = arith.constant dense<0.000000e+00> : vector<8x512xf32>
    %15 = tpu.matmul %13, %14, %cst_13 {dimension_numbers = #tpu.dot_dimension_numbers<[1], [0], [0], [1], [0, 0, 1, 1], [], []>} : vector<8x512xbf16>, vector<512x512xbf16>, vector<8x512xf32> -> vector<8x512xf32>
    %c0_14 = arith.constant 0 : index
    %c0_15 = arith.constant 0 : index
    %16 = vector.load %arg10[%c0_14, %c0_15] : memref<1x512xf32, #tpu.memory_space<vmem>>, vector<1x512xf32>
    %17 = vector.broadcast %16 : vector<1x512xf32> to vector<8x512xf32>
    %18 = arith.addf %15, %17 : vector<8x512xf32>
    %c0_16 = arith.constant 0 : index
    %c0_17 = arith.constant 0 : index
    %19 = vector.load %arg4[%c0_16, %c0_17] : memref<8x512xbf16, #tpu.memory_space<vmem>>, vector<8x512xbf16>
    %20 = arith.extf %19 : vector<8x512xbf16> to vector<8x512xf32>
    %21 = arith.mulf %18, %20 : vector<8x512xf32>
    %cst_18 = arith.constant 2.000000e-01 : f32
    %22 = vector.broadcast %cst_18 : f32 to vector<8x512xf32>
    %23 = arith.mulf %22, %21 : vector<8x512xf32>
    %24 = arith.maximumf %21, %23 : vector<8x512xf32>
    %25 = arith.truncf %24 : vector<8x512xf32> to vector<8x512xbf16>
    %c0_19 = arith.constant 0 : index
    %c0_20 = arith.constant 0 : index
    %26 = vector.load %arg11[%c0_19, %c0_20] : memref<512x512xbf16, #tpu.memory_space<vmem>>, vector<512x512xbf16>
    %cst_21 = arith.constant dense<0.000000e+00> : vector<8x512xf32>
    %27 = tpu.matmul %25, %26, %cst_21 {dimension_numbers = #tpu.dot_dimension_numbers<[1], [0], [0], [1], [0, 0, 1, 1], [], []>} : vector<8x512xbf16>, vector<512x512xbf16>, vector<8x512xf32> -> vector<8x512xf32>
    %c0_22 = arith.constant 0 : index
    %c0_23 = arith.constant 0 : index
    %28 = vector.load %arg12[%c0_22, %c0_23] : memref<1x512xf32, #tpu.memory_space<vmem>>, vector<1x512xf32>
    %29 = vector.broadcast %28 : vector<1x512xf32> to vector<8x512xf32>
    %30 = arith.addf %27, %29 : vector<8x512xf32>
    %c0_24 = arith.constant 0 : index
    %c0_25 = arith.constant 0 : index
    %31 = vector.load %arg5[%c0_24, %c0_25] : memref<8x512xbf16, #tpu.memory_space<vmem>>, vector<8x512xbf16>
    %32 = arith.extf %31 : vector<8x512xbf16> to vector<8x512xf32>
    %33 = arith.mulf %30, %32 : vector<8x512xf32>
    %cst_26 = arith.constant 2.000000e-01 : f32
    %34 = vector.broadcast %cst_26 : f32 to vector<8x512xf32>
    %35 = arith.mulf %34, %33 : vector<8x512xf32>
    %36 = arith.maximumf %33, %35 : vector<8x512xf32>
    %37 = arith.truncf %36 : vector<8x512xf32> to vector<8x512xbf16>
    %c0_27 = arith.constant 0 : index
    %c0_28 = arith.constant 0 : index
    %38 = vector.load %arg13[%c0_27, %c0_28] : memref<512x256xbf16, #tpu.memory_space<vmem>>, vector<512x256xbf16>
    %cst_29 = arith.constant dense<0.000000e+00> : vector<8x256xf32>
    %39 = tpu.matmul %37, %38, %cst_29 {dimension_numbers = #tpu.dot_dimension_numbers<[1], [0], [0], [1], [0, 0, 1, 1], [], []>} : vector<8x512xbf16>, vector<512x256xbf16>, vector<8x256xf32> -> vector<8x256xf32>
    %c0_30 = arith.constant 0 : index
    %c0_31 = arith.constant 0 : index
    %40 = vector.load %arg14[%c0_30, %c0_31] : memref<1x256xf32, #tpu.memory_space<vmem>>, vector<1x256xf32>
    %41 = vector.broadcast %40 : vector<1x256xf32> to vector<8x256xf32>
    %42 = arith.addf %39, %41 : vector<8x256xf32>
    %43 = vector.extract_strided_slice %42 {offsets = [0, 0], sizes = [8, 128], strides = [1, 1]} : vector<8x256xf32> to vector<8x128xf32>
    %44 = vector.extract_strided_slice %42 {offsets = [0, 128], sizes = [8, 128], strides = [1, 1]} : vector<8x256xf32> to vector<8x128xf32>
    %cst_32 = arith.constant 5.000000e-01 : f32
    %45 = vector.broadcast %cst_32 : f32 to vector<8x128xf32>
    %46 = arith.mulf %45, %44 : vector<8x128xf32>
    %47 = math.exp %46 : vector<8x128xf32>
    %c0_33 = arith.constant 0 : index
    %c0_34 = arith.constant 0 : index
    %48 = vector.load %arg3[%c0_33, %c0_34] : memref<8x128xf32, #tpu.memory_space<vmem>>, vector<8x128xf32>
    %49 = arith.mulf %47, %48 : vector<8x128xf32>
    %50 = arith.addf %43, %49 : vector<8x128xf32>
    %c0_35 = arith.constant 0 : index
    %c0_36 = arith.constant 0 : index
    %51 = vector.load %arg15[%c0_35, %c0_36] : memref<8x128xf32, #tpu.memory_space<vmem>>, vector<8x128xf32>
    tpu.vector_store %arg15[%c0_35, %c0_36], %50 {strides = array<i32>} : memref<8x128xf32, #tpu.memory_space<vmem>>, vector<8x128xf32>,
    %52 = arith.mulf %47, %47 : vector<8x128xf32>
    %c8_i32 = arith.constant 8 : i32
    %53 = arith.muli %arg0, %c8_i32 : i32
    %54 = tpu.iota {dimensions = array<i32: 0>} : vector<8x1xi32>
    %55 = vector.broadcast %53 : i32 to vector<8x1xi32>
    %56 = arith.addi %55, %54 : vector<8x1xi32>
    %c8_i32_37 = arith.constant 8 : i32
    %57 = vector.broadcast %c8_i32_37 : i32 to vector<8x1xi32>
    %58 = arith.cmpi slt, %56, %57 : vector<8x1xi32>
    %59 = arith.extui %58 : vector<8x1xi1> to vector<8x1xi32>
    %60 = arith.sitofp %59 : vector<8x1xi32> to vector<8x1xf32>
    %cst_38 = arith.constant 1.000000e+00 : f32
    %61 = vector.broadcast %cst_38 : f32 to vector<8x128xf32>
    %62 = arith.addf %61, %44 : vector<8x128xf32>
    %63 = arith.mulf %43, %43 : vector<8x128xf32>
    %64 = arith.subf %62, %63 : vector<8x128xf32>
    %65 = arith.subf %64, %52 : vector<8x128xf32>
    %66 = vector.broadcast %60 : vector<8x1xf32> to vector<8x128xf32>
    %67 = arith.mulf %66, %65 : vector<8x128xf32>
    %cst_39 = arith.constant dense<0.000000e+00> : vector<128xf32>
    %68 = vector.multi_reduction <add>, %67, %cst_39 [0] : vector<8x128xf32> to vector<128xf32>
    %69 = vector.shape_cast %68 : vector<128xf32> to vector<1x128xf32>
    %70 = vector.shape_cast %69 : vector<1x128xf32> to vector<1x1x128xf32>
    %c0_40 = arith.constant 0 : index
    %c0_41 = arith.constant 0 : index
    %c0_42 = arith.constant 0 : index
    %71 = vector.load %arg16[%c0_40, %c0_41, %c0_42] : memref<1x1x128xf32, #tpu.memory_space<vmem>>, vector<1x1x128xf32>
    tpu.vector_store %arg16[%c0_40, %c0_41, %c0_42], %70 {strides = array<i32>} : memref<1x1x128xf32, #tpu.memory_space<vmem>>, vector<1x1x128xf32>,
    return
  }
  func.func @transform_0(%arg0: i32) -> (i32, i32) {
    %c0_i32 = arith.constant 0 : i32
    %c0_i32_0 = arith.constant 0 : i32
    return %arg0, %c0_i32 : i32, i32
  }
  func.func @transform_1(%arg0: i32) -> (i32, i32) {
    %c0_i32 = arith.constant 0 : i32
    %c0_i32_0 = arith.constant 0 : i32
    return %arg0, %c0_i32 : i32, i32
  }
  func.func @transform_2(%arg0: i32) -> (i32, i32) {
    %c0_i32 = arith.constant 0 : i32
    %c0_i32_0 = arith.constant 0 : i32
    return %arg0, %c0_i32 : i32, i32
  }
  func.func @transform_3(%arg0: i32) -> (i32, i32) {
    %c0_i32 = arith.constant 0 : i32
    %c0_i32_0 = arith.constant 0 : i32
    return %arg0, %c0_i32 : i32, i32
  }
  func.func @transform_4(%arg0: i32) -> (i32, i32) {
    %c0_i32 = arith.constant 0 : i32
    %c0_i32_0 = arith.constant 0 : i32
    return %arg0, %c0_i32 : i32, i32
  }
  func.func @transform_5(%arg0: i32) -> (i32, i32) {
    %c0_i32 = arith.constant 0 : i32
    %c0_i32_0 = arith.constant 0 : i32
    %c0_i32_1 = arith.constant 0 : i32
    return %c0_i32, %c0_i32_0 : i32, i32
  }
  func.func @transform_6(%arg0: i32) -> (i32, i32) {
    %c0_i32 = arith.constant 0 : i32
    %c0_i32_0 = arith.constant 0 : i32
    %c0_i32_1 = arith.constant 0 : i32
    return %c0_i32, %c0_i32_0 : i32, i32
  }
  func.func @transform_7(%arg0: i32) -> (i32, i32) {
    %c0_i32 = arith.constant 0 : i32
    %c0_i32_0 = arith.constant 0 : i32
    %c0_i32_1 = arith.constant 0 : i32
    return %c0_i32, %c0_i32_0 : i32, i32
  }
  func.func @transform_8(%arg0: i32) -> (i32, i32) {
    %c0_i32 = arith.constant 0 : i32
    %c0_i32_0 = arith.constant 0 : i32
    %c0_i32_1 = arith.constant 0 : i32
    return %c0_i32, %c0_i32_0 : i32, i32
  }
  func.func @transform_9(%arg0: i32) -> (i32, i32) {
    %c0_i32 = arith.constant 0 : i32
    %c0_i32_0 = arith.constant 0 : i32
    %c0_i32_1 = arith.constant 0 : i32
    return %c0_i32, %c0_i32_0 : i32, i32
  }
  func.func @transform_10(%arg0: i32) -> (i32, i32) {
    %c0_i32 = arith.constant 0 : i32
    %c0_i32_0 = arith.constant 0 : i32
    %c0_i32_1 = arith.constant 0 : i32
    return %c0_i32, %c0_i32_0 : i32, i32
  }
  func.func @transform_11(%arg0: i32) -> (i32, i32) {
    %c0_i32 = arith.constant 0 : i32
    %c0_i32_0 = arith.constant 0 : i32
    %c0_i32_1 = arith.constant 0 : i32
    return %c0_i32, %c0_i32_0 : i32, i32
  }
  func.func @transform_12(%arg0: i32) -> (i32, i32) {
    %c0_i32 = arith.constant 0 : i32
    %c0_i32_0 = arith.constant 0 : i32
    %c0_i32_1 = arith.constant 0 : i32
    return %c0_i32, %c0_i32_0 : i32, i32
  }
  func.func @transform_13(%arg0: i32) -> (i32, i32) {
    %c0_i32 = arith.constant 0 : i32
    %c0_i32_0 = arith.constant 0 : i32
    %c0_i32_1 = arith.constant 0 : i32
    return %c0_i32, %c0_i32_0 : i32, i32
  }
  func.func @transform_14(%arg0: i32) -> (i32, i32) {
    %c0_i32 = arith.constant 0 : i32
    %c0_i32_0 = arith.constant 0 : i32
    return %arg0, %c0_i32 : i32, i32
  }
  func.func @transform_15(%arg0: i32) -> (i32, i32, i32) {
    %c0_i32 = arith.constant 0 : i32
    %c0_i32_0 = arith.constant 0 : i32
    %c0_i32_1 = arith.constant 0 : i32
    return %arg0, %c0_i32, %c0_i32_0 : i32, i32, i32
  }
}

</mosaic_0001>

<bundles_post_ra>
// kernel: tpu_custom_call.1
= control target key start
LH: loop header
LB: loop body
LE: loop exit
PB: predicated region body
PF: predicated region fallthrough
CT: control target
= control target key end

     0   :  { %21 = vsyncpa [#allocation3], 0  ;;  %s6386_s0 = inlined_call_operand.hbm [shape: bf16[8,784], index: 0, kind: input, shape index: {}]   ;;  %s6387_s1 = inlined_call_operand.hbm [shape: bf16[8,16], index: 1, kind: input, shape index: {}]   ;;  %s6388_s2 = inlined_call_operand.hbm [shape: f32[8,128], index: 2, kind: input, shape index: {}]   ;;  %s6389_s3 = inlined_call_operand.hbm [shape: bf16[8,512], index: 3, kind: input, shape index: {}]   ;;  %s6390_s4 = inlined_call_operand.hbm [shape: bf16[8,512], index: 4, kind: input, shape index: {}]   ;;  %s6391_s5 = inlined_call_operand.hbm [shape: bf16[784,512], index: 5, kind: input, shape index: {}]   ;;  %s6392_s6 = inlined_call_operand.hbm [shape: bf16[16,512], index: 6, kind: input, shape index: {}]   ;;  %s6393_s7 = inlined_call_operand.vmem [shape: f32[1,512], index: 7, kind: input, shape index: {}]   ;;  %s6394_s8 = inlined_call_operand.hbm [shape: bf16[512,512], index: 8, kind: input, shape index: {}]   ;;  %s6395_s9 = inlined_call_operand.vmem [shape: f32[1,512], index: 9, kind: input, shape index: {}]   ;;  %s6396_s10 = inlined_call_operand.hbm [shape: bf16[512,512], index: 10, kind: input, shape index: {}]   ;;  %s6397_s11 = inlined_call_operand.vmem [shape: f32[1,512], index: 11, kind: input, shape index: {}]   ;;  %s6398_s12 = inlined_call_operand.hbm [shape: bf16[512,256], index: 12, kind: input, shape index: {}]   ;;  %s6399_s13 = inlined_call_operand.vmem [shape: f32[1,256], index: 13, kind: input, shape index: {}]   ;;  %s6400_s14 = inlined_call_operand.hbm [shape: f32[8,128], index: 14, kind: output, shape index: {0}]   ;;  %s6401_s15 = inlined_call_operand.hbm [shape: f32[1,1,128], index: 15, kind: output, shape index: {1}]  }
   0x1   :  { %22 = vsyncpa [#allocation6], 0 }
   0x2   :  { %23 = vsyncpa [#allocation9], 0 }
   0x3   :  { %24 = vsyncpa [#allocation12], 0 }
   0x4   :  { %25 = vsyncpa [#allocation15], 0 }
   0x5   :  { %26 = vsyncpa [#allocation18], 0 }
   0x6   :  { %27 = vsyncpa [#allocation4], 0 }
   0x7   :  { %28 = vsyncpa [#allocation21], 0  ;;  %s6001_s18 = smov [#allocation5]   ;;  %s6002_s20 = smov [#allocation8]  }
   0x8   :  { %s45_s19 = sshll.u32 %s6001_s18, 4  ;;  %s65_s21 = sshll.u32 %s6002_s20, 4  ;;  %s46_s19 = int_to_ptr.vmem [resolvable:$true] %s45_s19  ;;  %s66_s21 = int_to_ptr.vmem [resolvable:$true] %s65_s21 }
   0x9   :  { %s5721_s24 = scalar_lea.hbm %s6387_s1, 64 }
   0xa   :  { %p5722_p0 = scmp.ne.s32.totalorder %s6387_s1, %s5721_s24  ;;  %p5725_p1 = scmp.lt.u32.totalorder %s5721_s24, %s6387_s1 }
   0xc   :  { %p5727_p2 = pnand %p5725_p1, %p5722_p0 }
   0xe   :  { %5730 = shalt.err (!%p5727_p2)
}
   0xf   :  { %s5731_s29 = scalar_lea.vmem %s46_s19, 64  ;;  %p5736_p4 = scmp.lt.s32.totalorder %s46_s19, %s46_s19 }
  0x10   :  { %p5732_p3 = scmp.ne.s32.totalorder %s46_s19, %s5731_s29  ;;  %p5737_p5 = scmp.lt.s32.totalorder %s5731_s29, %s5731_s29 }
  0x12   :  { %p5738_p6 = por %p5737_p5, %p5736_p4 }
  0x14   :  { %p5739_p7 = pnand %p5738_p6, %p5732_p3 }
  0x16   :  { %5742 = shalt.err (!%p5739_p7)
}
  0x17   :  { %48 = dma.hbm_to_vmem [thread:$0]  %s6387_s1, 64, %s46_s19, [#allocation6]  }
  0x18   :  { %s5743_s20 = scalar_lea.hbm %s6389_s3, 256 }
  0x19   :  { %p5744_p8 = scmp.ne.s32.totalorder %s6389_s3, %s5743_s20  ;;  %p5747_p9 = scmp.lt.u32.totalorder %s5743_s20, %s6389_s3 }
  0x1b   :  { %p5749_p10 = pnand %p5747_p9, %p5744_p8 }
  0x1d   :  { %5752 = shalt.err (!%p5749_p10)
}
  0x1e   :  { %s5753_s26 = scalar_lea.vmem %s66_s21, 256  ;;  %p5758_p12 = scmp.lt.s32.totalorder %s66_s21, %s66_s21 }
  0x1f   :  { %p5754_p11 = scmp.ne.s32.totalorder %s66_s21, %s5753_s26  ;;  %p5759_p13 = scmp.lt.s32.totalorder %s5753_s26, %s5753_s26 }
  0x21   :  { %p5760_p0 = por %p5759_p13, %p5758_p12 }
  0x23   :  { %p5761_p1 = pnand %p5760_p0, %p5754_p11 }
  0x25   :  { %5764 = shalt.err (!%p5761_p1)
}
  0x26   :  { %68 = dma.hbm_to_vmem [thread:$0]  %s6389_s3, 256, %s66_s21, [#allocation9]  }
  0x27   :  { %s6003_s27 = smov [#allocation11]   ;;  %s5765_s16 = scalar_lea.hbm %s6391_s5, 25088 }
  0x28   :  { %s84_s28 = sshll.u32 %s6003_s27, 4  ;;  %p5766_p2 = scmp.ne.s32.totalorder %s6391_s5, %s5765_s16  ;;  %s85_s28 = int_to_ptr.vmem [resolvable:$true] %s84_s28 }
  0x29   :  { %p5769_p3 = scmp.lt.u32.totalorder %s5765_s16, %s6391_s5 }
  0x2b   :  { %p5771_p4 = pnand %p5769_p3, %p5766_p2 }
  0x2d   :  { %5774 = shalt.err (!%p5771_p4)
}
  0x2e   :  { %s5775_s23 = scalar_lea.vmem %s85_s28, 25088  ;;  %p5780_p6 = scmp.lt.s32.totalorder %s85_s28, %s85_s28 }
  0x2f   :  { %p5776_p5 = scmp.ne.s32.totalorder %s85_s28, %s5775_s23  ;;  %p5781_p7 = scmp.lt.s32.totalorder %s5775_s23, %s5775_s23 }
  0x31   :  { %p5782_p8 = por %p5781_p7, %p5780_p6 }
  0x33   :  { %p5783_p9 = pnand %p5782_p8, %p5776_p5 }
  0x35   :  { %5786 = shalt.err (!%p5783_p9)
}
  0x36   :  { %s6004_s3 = smov 256   ;;  %s6005_s21 = smov 16  }
  0x37   :  { %90 = dma.hbm_to_vmem [thread:$0]  %s6391_s5, 25088, %s85_s28, [#allocation12], %s6004_s3, %s6004_s3, %s6005_s21  }
  0x38   :  { %s6006_s26 = smov [#allocation14]   ;;  %s6007_s19 = smov [#allocation2]  }
  0x39   :  { %s110_s1 = sshll.u32 %s6006_s26, 4  ;;  %s35_s27 = sshll.u32 %s6007_s19, 4  ;;  %s111_s1 = int_to_ptr.vmem [resolvable:$true] %s110_s1  ;;  %s36_s27 = int_to_ptr.vmem [resolvable:$true] %s35_s27 }
  0x3a   :  { %s5787_s16 = scalar_lea.hbm %s6394_s8, 16384 }
  0x3b   :  { %p5788_p10 = scmp.ne.s32.totalorder %s6394_s8, %s5787_s16  ;;  %p5791_p11 = scmp.lt.u32.totalorder %s5787_s16, %s6394_s8 }
  0x3d   :  { %p5793_p12 = pnand %p5791_p11, %p5788_p10 }
  0x3f   :  { %5796 = shalt.err (!%p5793_p12)
}
  0x40   :  { %s5797_s5 = scalar_lea.vmem %s111_s1, 16384  ;;  %p5802_p0 = scmp.lt.s32.totalorder %s111_s1, %s111_s1 }
  0x41   :  { %p5798_p13 = scmp.ne.s32.totalorder %s111_s1, %s5797_s5  ;;  %p5803_p1 = scmp.lt.s32.totalorder %s5797_s5, %s5797_s5 }
  0x43   :  { %p5804_p2 = por %p5803_p1, %p5802_p0 }
  0x45   :  { %p5805_p3 = pnand %p5804_p2, %p5798_p13 }
  0x47   :  { %5808 = shalt.err (!%p5805_p3)
}
  0x48   :  { %116 = dma.hbm_to_vmem [thread:$0]  %s6394_s8, 16384, %s111_s1, [#allocation15], %s6004_s3, %s6004_s3, %s6005_s21  }
  0x49   :  { %s5809_s26 = scalar_lea.hbm %s6386_s0, 448 }
  0x4a   :  { %p5810_p4 = scmp.ne.s32.totalorder %s6386_s0, %s5809_s26  ;;  %p5813_p5 = scmp.lt.u32.totalorder %s5809_s26, %s6386_s0 }
  0x4c   :  { %p5815_p6 = pnand %p5813_p5, %p5810_p4 }
  0x4e   :  { %5818 = shalt.err (!%p5815_p6)
}
  0x4f   :  { %s5819_s17 = scalar_lea.vmem %s36_s27, 448  ;;  %p5824_p8 = scmp.lt.s32.totalorder %s36_s27, %s36_s27 }
  0x50   :  { %p5820_p7 = scmp.ne.s32.totalorder %s36_s27, %s5819_s17  ;;  %p5825_p9 = scmp.lt.s32.totalorder %s5819_s17, %s5819_s17 }
  0x52   :  { %p5826_p10 = por %p5825_p9, %p5824_p8 }
  0x54   :  { %p5827_p11 = pnand %p5826_p10, %p5820_p7 }
  0x56   :  { %5830 = shalt.err (!%p5827_p11)
}
  0x57   :  { %38 = dma.hbm_to_vmem [thread:$0]  %s6386_s0, 448, %s36_s27, [#allocation3]  }
  0x58   :  { %s6008_s18 = smov [#allocation7]   ;;  %s6009_s22 = smov [#allocation10]  }
  0x59   :  { %s55_s20 = sshll.u32 %s6008_s18, 4  ;;  %s75_s5 = sshll.u32 %s6009_s22, 4  ;;  %s56_s20 = int_to_ptr.vmem [resolvable:$true] %s55_s20  ;;  %s76_s5 = int_to_ptr.vmem [resolvable:$true] %s75_s5 }
  0x5a   :  { %s5831_s24 = scalar_lea.hbm %s6388_s2, 128 }
  0x5b   :  { %p5832_p12 = scmp.ne.s32.totalorder %s6388_s2, %s5831_s24  ;;  %p5835_p13 = scmp.lt.u32.totalorder %s5831_s24, %s6388_s2 }
  0x5d   :  { %p5837_p0 = pnand %p5835_p13, %p5832_p12 }
  0x5f   :  { %5840 = shalt.err (!%p5837_p0)
}
  0x60   :  { %s5841_s0 = scalar_lea.vmem %s56_s20, 128  ;;  %p5846_p2 = scmp.lt.s32.totalorder %s56_s20, %s56_s20 }
  0x61   :  { %p5842_p1 = scmp.ne.s32.totalorder %s56_s20, %s5841_s0  ;;  %p5847_p3 = scmp.lt.s32.totalorder %s5841_s0, %s5841_s0 }
  0x63   :  { %p5848_p4 = por %p5847_p3, %p5846_p2 }
  0x65   :  { %p5849_p5 = pnand %p5848_p4, %p5842_p1 }
  0x67   :  { %5852 = shalt.err (!%p5849_p5)
}
  0x68   :  { %58 = dma.hbm_to_vmem [thread:$0]  %s6388_s2, 128, %s56_s20, [#allocation6]  }
  0x69   :  { %s5853_s8 = scalar_lea.hbm %s6390_s4, 256 }
  0x6a   :  { %p5854_p6 = scmp.ne.s32.totalorder %s6390_s4, %s5853_s8  ;;  %p5857_p7 = scmp.lt.u32.totalorder %s5853_s8, %s6390_s4 }
  0x6c   :  { %p5859_p8 = pnand %p5857_p7, %p5854_p6 }
  0x6e   :  { %5862 = shalt.err (!%p5859_p8)
}
  0x6f   :  { %s5863_s23 = scalar_lea.vmem %s76_s5, 256  ;;  %p5868_p10 = scmp.lt.s32.totalorder %s76_s5, %s76_s5 }
  0x70   :  { %p5864_p9 = scmp.ne.s32.totalorder %s76_s5, %s5863_s23  ;;  %p5869_p11 = scmp.lt.s32.totalorder %s5863_s23, %s5863_s23 }
  0x72   :  { %p5870_p12 = por %p5869_p11, %p5868_p10 }
  0x74   :  { %p5871_p13 = pnand %p5870_p12, %p5864_p9 }
  0x76   :  { %5874 = shalt.err (!%p5871_p13)
}
  0x77   :  { %78 = dma.hbm_to_vmem [thread:$0]  %s6390_s4, 256, %s76_s5, [#allocation9]  }
  0x78   :  { %s6010_s24 = smov [#allocation13]   ;;  %s6011_s26 = smov [#allocation16]  }
  0x79   :  { %s96_s25 = sshll.u32 %s6010_s24, 4  ;;  %s124_s19 = sshll.u32 %s6011_s26, 4  ;;  %s97_s25 = int_to_ptr.vmem [resolvable:$true] %s96_s25  ;;  %s125_s19 = int_to_ptr.vmem [resolvable:$true] %s124_s19 }
  0x7a   :  { %s5875_s27 = scalar_lea.hbm %s6392_s6, 512 }
  0x7b   :  { %p5876_p0 = scmp.ne.s32.totalorder %s6392_s6, %s5875_s27  ;;  %p5879_p1 = scmp.lt.u32.totalorder %s5875_s27, %s6392_s6 }
  0x7d   :  { %p5881_p2 = pnand %p5879_p1, %p5876_p0 }
  0x7f   :  { %5884 = shalt.err (!%p5881_p2)
}
  0x80   :  { %s5885_s4 = scalar_lea.vmem %s97_s25, 512  ;;  %p5890_p4 = scmp.lt.s32.totalorder %s97_s25, %s97_s25 }
  0x81   :  { %p5886_p3 = scmp.ne.s32.totalorder %s97_s25, %s5885_s4  ;;  %p5891_p5 = scmp.lt.s32.totalorder %s5885_s4, %s5885_s4 }
  0x83   :  { %p5892_p6 = por %p5891_p5, %p5890_p4 }
  0x85   :  { %p5893_p7 = pnand %p5892_p6, %p5886_p3 }
  0x87   :  { %5896 = shalt.err (!%p5893_p7)
}
  0x88   :  { %102 = dma.hbm_to_vmem [thread:$0]  %s6392_s6, 512, %s97_s25, [#allocation12], %s6004_s3, %s6004_s3, %s6005_s21  }
  0x89   :  { %s5897_s28 = scalar_lea.hbm %s6396_s10, 16384 }
  0x8a   :  { %p5898_p8 = scmp.ne.s32.totalorder %s6396_s10, %s5897_s28  ;;  %p5901_p9 = scmp.lt.u32.totalorder %s5897_s28, %s6396_s10 }
  0x8c   :  { %p5903_p10 = pnand %p5901_p9, %p5898_p8 }
  0x8e   :  { %5906 = shalt.err (!%p5903_p10)
}
  0x8f   :  { %s5907_s26 = scalar_lea.vmem %s125_s19, 16384  ;;  %p5912_p12 = scmp.lt.s32.totalorder %s125_s19, %s125_s19 }
  0x90   :  { %p5908_p11 = scmp.ne.s32.totalorder %s125_s19, %s5907_s26  ;;  %p5913_p13 = scmp.lt.s32.totalorder %s5907_s26, %s5907_s26 }
  0x92   :  { %p5914_p0 = por %p5913_p13, %p5912_p12 }
  0x94   :  { %p5915_p1 = pnand %p5914_p0, %p5908_p11 }
  0x96   :  { %5918 = shalt.err (!%p5915_p1)
}
  0x97   :  { %130 = dma.hbm_to_vmem [thread:$0]  %s6396_s10, 16384, %s125_s19, [#allocation15], %s6004_s3, %s6004_s3, %s6005_s21  }
  0x98   :  { %s6012_s29 = smov [#allocation17]   ;;  %s5919_s16 = scalar_lea.hbm %s6398_s12, 8192 }
  0x99   :  { %s138_s0 = sshll.u32 %s6012_s29, 4  ;;  %p5920_p2 = scmp.ne.s32.totalorder %s6398_s12, %s5919_s16  ;;  %s139_s0 = int_to_ptr.vmem [resolvable:$true] %s138_s0 }
  0x9a   :  { %p5923_p3 = scmp.lt.u32.totalorder %s5919_s16, %s6398_s12 }
  0x9c   :  { %p5925_p4 = pnand %p5923_p3, %p5920_p2 }
  0x9e   :  { %5928 = shalt.err (!%p5925_p4)
}
  0x9f   :  { %s5929_s1 = scalar_lea.vmem %s139_s0, 8192  ;;  %p5934_p6 = scmp.lt.s32.totalorder %s139_s0, %s139_s0 }
  0xa0   :  { %p5930_p5 = scmp.ne.s32.totalorder %s139_s0, %s5929_s1  ;;  %p5935_p7 = scmp.lt.s32.totalorder %s5929_s1, %s5929_s1 }
  0xa2   :  { %p5936_p8 = por %p5935_p7, %p5934_p6 }
  0xa4   :  { %p5937_p9 = pnand %p5936_p8, %p5930_p5 }
  0xa6   :  { %5940 = shalt.err (!%p5937_p9)
}
  0xa7   :  { %s6013_s10 = smov 128   ;;  %s6014_s3 = smov 8  }
  0xa8   :  { %144 = dma.hbm_to_vmem [thread:$0]  %s6398_s12, 8192, %s139_s0, [#allocation18], %s6013_s10, %s6013_s10, %s6014_s3  }
  0xa9   :  { %5985 = dma.done.wait [#allocation3], 448  }
  0xaa   :  { %5986 = vsyncadd [#allocation3], 4294966848 }
  0xab   :  { %5987 = dma.done.wait [#allocation6], 192  }
  0xac   :  { %5988 = vsyncadd [#allocation6], 4294967104 }
  0xad   :  { %5989 = dma.done.wait [#allocation9], 512  }
  0xae   :  { %5990 = vsyncadd [#allocation9], 4294966784 }
  0xaf   :  { %5991 = dma.done.wait [#allocation12], 25600  }
  0xb0   :  { %5992 = vsyncadd [#allocation12], 4294941696 }
  0xb1   :  { %5993 = dma.done.wait [#allocation15], 32768  }
  0xb2   :  { %5994 = vsyncadd [#allocation15], 4294934528 }
  0xb3   :  { %5995 = dma.done.wait [#allocation18], 8192  }
  0xb4   :  { %5996 = vsyncadd [#allocation18], 4294959104  ;;  %v6015_v0 = vmov 0   ;;  %v4932_v1 = vld [vmem:[#allocation13 + $0xc] ss:$16 sps:$4 sm:$0xff]   ;;  %vm403_vm0 = vcmask 130048  }
  0xb5   :  { %480 = vmatprep.mubr.bf16.mxu1 %v6015_v0  ;;  %439 = vmatprep.mubr.bf16.mxu0 %v6015_v0  ;;  %v4934_v2 = vld [vmem:[#allocation13 + $0x8] ss:$16 sps:$4 sm:$0xff]   ;;  %v378_v3 = vld [vmem:[#allocation5] sm:$0xf]  ;;  %v4935_v5 = vld [vmem:[#allocation11] ss:$16 sps:$4 sm:$0xff]  }
  0xb6   :  { %448 = vmatprep.subr.bf16.mxu1 %v4932_v1  ;;  %v4937_v4 = vld [vmem:[#allocation11 + $0x4] ss:$16 sps:$4 sm:$0xff]   ;;  %v4938_v7 = vld [vmem:[#allocation11 + $0x20] ss:$16 sps:$4 sm:$0xff]   ;;  %v6233_v19 = vld [vmem:[#allocation2] sm:$0xff]  ;;  %s6016_s2 = smov [#allocation19]  }
  0xb7   :  { %449 = vmatpush1.bf16.msra.mxu1 %v4934_v2  ;;  %v4940_v6 = vld [vmem:[#allocation11 + $0x24] ss:$16 sps:$4 sm:$0xff]   ;;  %v4941_v9 = vld [vmem:[#allocation11 + $0x40] ss:$16 sps:$4 sm:$0xff]   ;;  %v6237_v21 = vcombine.high %v6233_v19, %v6233_v19  ;;  %v6243_v63 = vcombine.low %v6233_v19, %v6233_v19 }
  0xb8   :  { %1496 = vmatprep.subr.bf16.mxu1 %v4937_v4  ;;  %v4943_v8 = vld [vmem:[#allocation11 + $0x44] ss:$16 sps:$4 sm:$0xff]   ;;  %v4944_v11 = vld [vmem:[#allocation11 + $0x60] ss:$16 sps:$4 sm:$0xff]  }
  0xb9   :  { %v4946_v10 = vld [vmem:[#allocation11 + $0x64] ss:$16 sps:$4 sm:$0xff]   ;;  %v4947_v13 = vld [vmem:[#allocation11 + $0x80] ss:$16 sps:$4 sm:$0xff]  }
  0xba   :  { %4359 = vmatmul.mubr.msk.bf16.vlgmr.msra.gmra.mrb[0].mxu1 %vm403_vm0, %v378_v3  ;;  %v4949_v12 = vld [vmem:[#allocation11 + $0x84] ss:$16 sps:$4 sm:$0xff]   ;;  %v4950_v16 = vld [vmem:[#allocation11 + $0xa0] ss:$16 sps:$4 sm:$0xff]  }
  0xbb   :  { %1497 = vmatpush1.bf16.msra.mxu1 %v4935_v5  ;;  %v4952_v14 = vld [vmem:[#allocation11 + $0xa4] ss:$16 sps:$4 sm:$0xff]   ;;  %v4985_v18 = vld [vmem:[#allocation13] ss:$16 sps:$4 sm:$0xff]   ;;  %1528 = vmatprep.mubr.bf16.mxu1 %v6237_v21 }
  0xbc   :  { %1498 = vmatprep.subr.bf16.mxu1 %v4940_v6  ;;  %v4980_v15 = vld [vmem:[#allocation13 + $0x4] ss:$16 sps:$4 sm:$0xff]   ;;  %v4953_v20 = vld [vmem:[#allocation11 + $0xc0] ss:$16 sps:$4 sm:$0xff]   ;;  %v180_v6 = vld [vmem:[#allocation2 + $0x10] sm:$0xff] }
  0xbd   :  { %v4955_v17 = vld [vmem:[#allocation11 + $0xc4] ss:$16 sps:$4 sm:$0xff]   ;;  %407 = vmatprep.subr.bf16.mxu0 %v4980_v15  ;;  %v4991_v22 = vld [vmem:[#allocation11 + $0x400] ss:$16 sps:$4 sm:$0xff]  }
  0xbe   :  { %408 = vmatpush1.bf16.msra.mxu0 %v4985_v18  ;;  %v4993_v23 = vld [vmem:[#allocation11 + $0x404] ss:$16 sps:$4 sm:$0xff]   ;;  %v4997_v26 = vld [vmem:[#allocation11 + $0x420] ss:$16 sps:$4 sm:$0xff]  }
  0xbf   :  { %1499 = vmatpush1.bf16.msra.mxu1 %v4938_v7  ;;  %v4958_v24 = vld [vmem:[#allocation11 + $0xe4] ss:$16 sps:$4 sm:$0xff]   ;;  %1578 = vmatprep.subr.bf16.mxu0 %v4993_v23  ;;  %v4956_v27 = vld [vmem:[#allocation11 + $0xe0] ss:$16 sps:$4 sm:$0xff]  }
  0xc0   :  { %1500 = vmatprep.subr.bf16.mxu1 %v4943_v8  ;;  %v4999_v25 = vld [vmem:[#allocation11 + $0x424] ss:$16 sps:$4 sm:$0xff]   ;;  %v4959_v30 = vld [vmem:[#allocation11 + $0x100] ss:$16 sps:$4 sm:$0xff]  }
  0xc1   :  { %4358 = vmatmul.mubr.msk.bf16.vlgmr.msra.gmra.mrb[0].mxu0 %vm403_vm0, %v378_v3  ;;  %v4961_v28 = vld [vmem:[#allocation11 + $0x104] ss:$16 sps:$4 sm:$0xff]   ;;  %v5003_v31 = vld [vmem:[#allocation11 + $0x440] ss:$16 sps:$4 sm:$0xff]  }
  0xc2   :  { %1579 = vmatpush1.bf16.msra.mxu0 %v4991_v22  ;;  %v5005_v29 = vld [vmem:[#allocation11 + $0x444] ss:$16 sps:$4 sm:$0xff]   ;;  %v4962_v34 = vld [vmem:[#allocation11 + $0x120] ss:$16 sps:$4 sm:$0xff]  }
  0xc3   :  { %1501 = vmatpush1.bf16.msra.mxu1 %v4941_v9  ;;  %1580 = vmatprep.subr.bf16.mxu0 %v4999_v25  ;;  %v5011_v32 = vld [vmem:[#allocation11 + $0x464] ss:$16 sps:$4 sm:$0xff]   ;;  %v5009_v35 = vld [vmem:[#allocation11 + $0x460] ss:$16 sps:$4 sm:$0xff]   ;;  %v6250_v9 = vcombine.high %v180_v6, %v180_v6 }
  0xc4   :  { %1502 = vmatprep.subr.bf16.mxu1 %v4946_v10  ;;  %v4964_v33 = vld [vmem:[#allocation11 + $0x124] ss:$16 sps:$4 sm:$0xff]   ;;  %v4965_v38 = vld [vmem:[#allocation11 + $0x140] ss:$16 sps:$4 sm:$0xff]  }
  0xc5   :  { %v5017_v36 = vld [vmem:[#allocation11 + $0x484] ss:$16 sps:$4 sm:$0xff]   ;;  %v5015_v39 = vld [vmem:[#allocation11 + $0x480] ss:$16 sps:$4 sm:$0xff]   ;;  %1610 = vmatprep.mubr.bf16.mxu0 %v6250_v9 }
  0xc6   :  { %1581 = vmatpush1.bf16.msra.mxu0 %v4997_v26  ;;  %v4967_v37 = vld [vmem:[#allocation11 + $0x144] ss:$16 sps:$4 sm:$0xff]   ;;  %v4968_v42 = vld [vmem:[#allocation11 + $0x160] ss:$16 sps:$4 sm:$0xff]  }
  0xc7   :  { %1503 = vmatpush1.bf16.msra.mxu1 %v4944_v11  ;;  %1582 = vmatprep.subr.bf16.mxu0 %v5005_v29  ;;  %v5023_v40 = vld [vmem:[#allocation11 + $0x4a4] ss:$16 sps:$4 sm:$0xff]   ;;  %v5021_v43 = vld [vmem:[#allocation11 + $0x4a0] ss:$16 sps:$4 sm:$0xff]  }
  0xc8   :  { %1504 = vmatprep.subr.bf16.mxu1 %v4949_v12  ;;  %v4970_v41 = vld [vmem:[#allocation11 + $0x164] ss:$16 sps:$4 sm:$0xff]   ;;  %v4971_v46 = vld [vmem:[#allocation11 + $0x180] ss:$16 sps:$4 sm:$0xff]  }
  0xc9   :  { %v5029_v44 = vld [vmem:[#allocation11 + $0x4c4] ss:$16 sps:$4 sm:$0xff]   ;;  %v5027_v47 = vld [vmem:[#allocation11 + $0x4c0] ss:$16 sps:$4 sm:$0xff]  }
  0xca   :  { %1583 = vmatpush1.bf16.msra.mxu0 %v5003_v31  ;;  %v4973_v45 = vld [vmem:[#allocation11 + $0x184] ss:$16 sps:$4 sm:$0xff]   ;;  %v4974_v50 = vld [vmem:[#allocation11 + $0x1a0] ss:$16 sps:$4 sm:$0xff]   ;;  %v5095_v31 = vld [vmem:[#allocation11 + $0x208] ss:$16 sps:$4 sm:$0xff]  }
  0xcb   :  { %1505 = vmatpush1.bf16.msra.mxu1 %v4947_v13  ;;  %1584 = vmatprep.subr.bf16.mxu0 %v5011_v32  ;;  %v5035_v48 = vld [vmem:[#allocation11 + $0x4e4] ss:$16 sps:$4 sm:$0xff]   ;;  %v5033_v51 = vld [vmem:[#allocation11 + $0x4e0] ss:$16 sps:$4 sm:$0xff]   ;;  %v5103_v32 = vld [vmem:[#allocation11 + $0x22c] ss:$16 sps:$4 sm:$0xff]  }
  0xcc   :  { %1506 = vmatprep.subr.bf16.mxu1 %v4952_v14  ;;  %v4976_v49 = vld [vmem:[#allocation11 + $0x1a4] ss:$16 sps:$4 sm:$0xff]   ;;  %v4977_v54 = vld [vmem:[#allocation11 + $0x1c0] ss:$16 sps:$4 sm:$0xff]  }
  0xcd   :  { %v5041_v52 = vld [vmem:[#allocation11 + $0x504] ss:$16 sps:$4 sm:$0xff]   ;;  %v5039_v55 = vld [vmem:[#allocation11 + $0x500] ss:$16 sps:$4 sm:$0xff]  }
  0xce   :  { %1585 = vmatpush1.bf16.msra.mxu0 %v5009_v35  ;;  %v4979_v53 = vld [vmem:[#allocation11 + $0x1c4] ss:$16 sps:$4 sm:$0xff]   ;;  %v4982_v58 = vld [vmem:[#allocation11 + $0x1e0] ss:$16 sps:$4 sm:$0xff]   ;;  %v5101_v35 = vld [vmem:[#allocation11 + $0x228] ss:$16 sps:$4 sm:$0xff]  }
  0xcf   :  { %1507 = vmatpush1.bf16.msra.mxu1 %v4950_v16  ;;  %1586 = vmatprep.subr.bf16.mxu0 %v5017_v36  ;;  %v5047_v56 = vld [vmem:[#allocation11 + $0x524] ss:$16 sps:$4 sm:$0xff]   ;;  %v5045_v59 = vld [vmem:[#allocation11 + $0x520] ss:$16 sps:$4 sm:$0xff]   ;;  %v5109_v36 = vld [vmem:[#allocation11 + $0x24c] ss:$16 sps:$4 sm:$0xff]  }
  0xd0   :  { %1508 = vmatprep.subr.bf16.mxu1 %v4955_v17  ;;  %v4984_v57 = vld [vmem:[#allocation11 + $0x1e4] ss:$16 sps:$4 sm:$0xff]   ;;  %v4988_v62 = vld [vmem:[#allocation11 + $0x200] ss:$16 sps:$4 sm:$0xff]  }
  0xd1   :  { %v5053_v60 = vld [vmem:[#allocation11 + $0x544] ss:$16 sps:$4 sm:$0xff]   ;;  %v5051_v1 = vld [vmem:[#allocation11 + $0x540] ss:$16 sps:$4 sm:$0xff]  }
  0xd2   :  { %1587 = vmatpush1.bf16.msra.mxu0 %v5015_v39  ;;  %v4990_v61 = vld [vmem:[#allocation11 + $0x204] ss:$16 sps:$4 sm:$0xff]   ;;  %v4994_v7 = vld [vmem:[#allocation11 + $0x220] ss:$16 sps:$4 sm:$0xff]   ;;  %v5107_v39 = vld [vmem:[#allocation11 + $0x248] ss:$16 sps:$4 sm:$0xff]  }
  0xd3   :  { %1509 = vmatpush1.bf16.msra.mxu1 %v4953_v20  ;;  %1588 = vmatprep.subr.bf16.mxu0 %v5023_v40  ;;  %v5059_v2 = vld [vmem:[#allocation11 + $0x564] ss:$16 sps:$4 sm:$0xff]   ;;  %v5057_v8 = vld [vmem:[#allocation11 + $0x560] ss:$16 sps:$4 sm:$0xff]   ;;  %v5115_v40 = vld [vmem:[#allocation11 + $0x26c] ss:$16 sps:$4 sm:$0xff]  }
  0xd4   :  { %1510 = vmatprep.subr.bf16.mxu1 %v4958_v24  ;;  %v6245_v3 = vld [vmem:[#allocation2 + $0x8] sm:$0xff] }
  0xd5   :  { %v4996_v4 = vld [vmem:[#allocation11 + $0x224] ss:$16 sps:$4 sm:$0xff]   ;;  %v4363_v5 = vcombine.high %v6245_v3, %v6245_v3  ;;  %v5000_v12 = vld [vmem:[#allocation11 + $0x240] ss:$16 sps:$4 sm:$0xff]  }
  0xd6   :  { %1589 = vmatpush1.bf16.msra.mxu0 %v5021_v43  ;;  %v5065_v10 = vld [vmem:[#allocation11 + $0x584] ss:$16 sps:$4 sm:$0xff]   ;;  %v5063_v13 = vld [vmem:[#allocation11 + $0x580] ss:$16 sps:$4 sm:$0xff]   ;;  %v5113_v43 = vld [vmem:[#allocation11 + $0x268] ss:$16 sps:$4 sm:$0xff]  }
  0xd7   :  { %1511 = vmatpush1.bf16.msra.mxu1 %v4956_v27  ;;  %1590 = vmatprep.subr.bf16.mxu0 %v5029_v44  ;;  %v5002_v11 = vld [vmem:[#allocation11 + $0x244] ss:$16 sps:$4 sm:$0xff]   ;;  %v5006_v16 = vld [vmem:[#allocation11 + $0x260] ss:$16 sps:$4 sm:$0xff]   ;;  %v5097_v27 = vld [vmem:[#allocation11 + $0x20c] ss:$16 sps:$4 sm:$0xff]  }
  0xd8   :  { %1512 = vmatprep.subr.bf16.mxu1 %v4961_v28  ;;  %v5071_v14 = vld [vmem:[#allocation11 + $0x5a4] ss:$16 sps:$4 sm:$0xff]   ;;  %v5069_v17 = vld [vmem:[#allocation11 + $0x5a0] ss:$16 sps:$4 sm:$0xff]   ;;  %v5121_v44 = vld [vmem:[#allocation11 + $0x28c] ss:$16 sps:$4 sm:$0xff]  }
  0xd9   :  { %v5008_v15 = vld [vmem:[#allocation11 + $0x264] ss:$16 sps:$4 sm:$0xff]   ;;  %v5012_v20 = vld [vmem:[#allocation11 + $0x280] ss:$16 sps:$4 sm:$0xff]  }
  0xda   :  { %1591 = vmatpush1.bf16.msra.mxu0 %v5027_v47  ;;  %v5077_v18 = vld [vmem:[#allocation11 + $0x5c4] ss:$16 sps:$4 sm:$0xff]   ;;  %v5075_v22 = vld [vmem:[#allocation11 + $0x5c0] ss:$16 sps:$4 sm:$0xff]   ;;  %v5119_v47 = vld [vmem:[#allocation11 + $0x288] ss:$16 sps:$4 sm:$0xff]  }
  0xdb   :  { %1513 = vmatpush1.bf16.msra.mxu1 %v4959_v30  ;;  %1592 = vmatprep.subr.bf16.mxu0 %v5035_v48  ;;  %v5014_v19 = vld [vmem:[#allocation11 + $0x284] ss:$16 sps:$4 sm:$0xff]   ;;  %v5018_v25 = vld [vmem:[#allocation11 + $0x2a0] ss:$16 sps:$4 sm:$0xff]   ;;  %v6253_v30 = vcombine.low %v180_v6, %v180_v6  ;;  %v5127_v48 = vld [vmem:[#allocation11 + $0x2ac] ss:$16 sps:$4 sm:$0xff]  }
  0xdc   :  { %1514 = vmatprep.subr.bf16.mxu1 %v4964_v33  ;;  %v5083_v23 = vld [vmem:[#allocation11 + $0x5e4] ss:$16 sps:$4 sm:$0xff]   ;;  %v5081_v26 = vld [vmem:[#allocation11 + $0x5e0] ss:$16 sps:$4 sm:$0xff]   ;;  %v5149_v6 = vld [vmem:[#allocation11 + $0x328] ss:$16 sps:$4 sm:$0xff]  }
  0xdd   :  { %v5020_v24 = vld [vmem:[#allocation11 + $0x2a4] ss:$16 sps:$4 sm:$0xff]   ;;  %v5024_v29 = vld [vmem:[#allocation11 + $0x2c0] ss:$16 sps:$4 sm:$0xff]  }
  0xde   :  { %1593 = vmatpush1.bf16.msra.mxu0 %v5033_v51  ;;  %v5026_v28 = vld [vmem:[#allocation11 + $0x2c4] ss:$16 sps:$4 sm:$0xff]   ;;  %v5125_v51 = vld [vmem:[#allocation11 + $0x2a8] ss:$16 sps:$4 sm:$0xff]  }
  0xdf   :  { %1515 = vmatpush1.bf16.msra.mxu1 %v4962_v34  ;;  %1594 = vmatprep.subr.bf16.mxu0 %v5041_v52  ;;  %v5032_v33 = vld [vmem:[#allocation11 + $0x2e4] ss:$16 sps:$4 sm:$0xff]   ;;  %v5030_v34 = vld [vmem:[#allocation11 + $0x2e0] ss:$16 sps:$4 sm:$0xff]   ;;  %v5133_v52 = vld [vmem:[#allocation11 + $0x2cc] ss:$16 sps:$4 sm:$0xff]  }
  0xe0   :  { %1516 = vmatprep.subr.bf16.mxu1 %v4967_v37  ;;  %v5038_v37 = vld [vmem:[#allocation11 + $0x304] ss:$16 sps:$4 sm:$0xff]  }
  0xe2   :  { %1595 = vmatpush1.bf16.msra.mxu0 %v5039_v55  ;;  %v5131_v55 = vld [vmem:[#allocation11 + $0x2c8] ss:$16 sps:$4 sm:$0xff]  }
  0xe3   :  { %1517 = vmatpush1.bf16.msra.mxu1 %v4965_v38  ;;  %1596 = vmatprep.subr.bf16.mxu0 %v5047_v56  ;;  %v5036_v38 = vld [vmem:[#allocation11 + $0x300] ss:$16 sps:$4 sm:$0xff]   ;;  %v5139_v56 = vld [vmem:[#allocation11 + $0x2ec] ss:$16 sps:$4 sm:$0xff]  }
  0xe4   :  { %1518 = vmatprep.subr.bf16.mxu1 %v4970_v41  ;;  %v5044_v41 = vld [vmem:[#allocation11 + $0x324] ss:$16 sps:$4 sm:$0xff]  }
  0xe6   :  { %1597 = vmatpush1.bf16.msra.mxu0 %v5045_v59  ;;  %v5137_v59 = vld [vmem:[#allocation11 + $0x2e8] ss:$16 sps:$4 sm:$0xff]  }
  0xe7   :  { %1519 = vmatpush1.bf16.msra.mxu1 %v4968_v42  ;;  %1598 = vmatprep.subr.bf16.mxu0 %v5053_v60  ;;  %v5042_v42 = vld [vmem:[#allocation11 + $0x320] ss:$16 sps:$4 sm:$0xff]   ;;  %v5145_v60 = vld [vmem:[#allocation11 + $0x30c] ss:$16 sps:$4 sm:$0xff]  }
  0xe8   :  { %1520 = vmatprep.subr.bf16.mxu1 %v4973_v45  ;;  %v5050_v45 = vld [vmem:[#allocation11 + $0x344] ss:$16 sps:$4 sm:$0xff]  }
  0xea   :  { %1599 = vmatpush1.bf16.msra.mxu0 %v5051_v1  ;;  %v5143_v1 = vld [vmem:[#allocation11 + $0x308] ss:$16 sps:$4 sm:$0xff]  }
  0xeb   :  { %1521 = vmatpush1.bf16.msra.mxu1 %v4971_v46  ;;  %1600 = vmatprep.subr.bf16.mxu0 %v5059_v2  ;;  %v5048_v46 = vld [vmem:[#allocation11 + $0x340] ss:$16 sps:$4 sm:$0xff]   ;;  %v5151_v2 = vld [vmem:[#allocation11 + $0x32c] ss:$16 sps:$4 sm:$0xff]  }
  0xec   :  { %1522 = vmatprep.subr.bf16.mxu1 %v4976_v49  ;;  %v5056_v49 = vld [vmem:[#allocation11 + $0x364] ss:$16 sps:$4 sm:$0xff]  }
  0xee   :  { %1601 = vmatpush1.bf16.msra.mxu0 %v5057_v8  ;;  %v5088_v8 = vld [vmem:[#allocation11 + $0x604] ss:$16 sps:$4 sm:$0xff]  }
  0xef   :  { %1523 = vmatpush1.bf16.msra.mxu1 %v4974_v50  ;;  %1602 = vmatprep.subr.bf16.mxu0 %v5065_v10  ;;  %v5054_v50 = vld [vmem:[#allocation11 + $0x360] ss:$16 sps:$4 sm:$0xff]  }
  0xf0   :  { %1524 = vmatprep.subr.bf16.mxu1 %v4979_v53  ;;  %v5062_v53 = vld [vmem:[#allocation11 + $0x384] ss:$16 sps:$4 sm:$0xff]   ;;  %v5086_v10 = vld [vmem:[#allocation11 + $0x600] ss:$16 sps:$4 sm:$0xff]  }
  0xf2   :  { %1603 = vmatpush1.bf16.msra.mxu0 %v5063_v13  ;;  %v5093_v13 = vld [vmem:[#allocation11 + $0xc] ss:$16 sps:$4 sm:$0xff]  }
  0xf3   :  { %1525 = vmatpush1.bf16.msra.mxu1 %v4977_v54  ;;  %1604 = vmatprep.subr.bf16.mxu0 %v5071_v14  ;;  %v5060_v54 = vld [vmem:[#allocation11 + $0x380] ss:$16 sps:$4 sm:$0xff]   ;;  %v5161_v14 = vld [vmem:[#allocation11 + $0x368] ss:$16 sps:$4 sm:$0xff]  }
  0xf4   :  { %1526 = vmatprep.subr.bf16.mxu1 %v4984_v57  ;;  %v5068_v57 = vld [vmem:[#allocation11 + $0x3a4] ss:$16 sps:$4 sm:$0xff]  }
  0xf6   :  { %1605 = vmatpush1.bf16.msra.mxu0 %v5069_v17  ;;  %v5094_v17 = vld [vmem:[#allocation2 + $0x18] ss:$0 sps:$4 sm:$0xff]  }
  0xf7   :  { %1527 = vmatpush1.bf16.msra.mxu1 %v4982_v58  ;;  %1606 = vmatprep.subr.bf16.mxu0 %v5077_v18  ;;  %v5066_v58 = vld [vmem:[#allocation11 + $0x3a0] ss:$16 sps:$4 sm:$0xff]   ;;  %v5167_v18 = vld [vmem:[#allocation11 + $0x388] ss:$16 sps:$4 sm:$0xff]  }
  0xf8   :  { %1537 = vmatprep.subr.bf16.mxu1 %v4990_v61  ;;  %v5074_v61 = vld [vmem:[#allocation11 + $0x3c4] ss:$16 sps:$4 sm:$0xff]  }
  0xfa   :  { %1529 = vmatmul.mubr.bf16.vlgmr.msra.gmra.mrb[4].mxu1 %v6243_v63  ;;  %1607 = vmatpush1.bf16.msra.mxu0 %v5075_v22  ;;  %v5173_v22 = vld [vmem:[#allocation11 + $0x3a8] ss:$16 sps:$4 sm:$0xff]  }
  0xfb   :  { %1538 = vmatpush1.bf16.msra.mxu1 %v4988_v62  ;;  %1569 = vmatprep.mubr.bf16.mxu1 %v4363_v5  ;;  %v5072_v62 = vld [vmem:[#allocation11 + $0x3c0] ss:$16 sps:$4 sm:$0xff]  }
  0xfc   :  { %1539 = vmatprep.subr.bf16.mxu1 %v4996_v4  ;;  %1608 = vmatprep.subr.bf16.mxu0 %v5083_v23  ;;  %v5080_v4 = vld [vmem:[#allocation11 + $0x3e4] ss:$16 sps:$4 sm:$0xff]   ;;  %v5098_v23 = vld [vmem:[#allocation11 + $0x28] ss:$16 sps:$4 sm:$0xff]  }
  0xfe   :  { %1609 = vmatpush1.bf16.msra.mxu0 %v5081_v26  ;;  %v5179_v26 = vld [vmem:[#allocation11 + $0x3c8] ss:$16 sps:$4 sm:$0xff]  }
  0xff   :  { %1540 = vmatpush1.bf16.msra.mxu1 %v4994_v7  ;;  %1701 = vmatprep.subr.bf16.mxu0 %v5097_v27  ;;  %v5157_v7 = vld [vmem:[#allocation11 + $0x34c] ss:$16 sps:$4 sm:$0xff]   ;;  %v5104_v27 = vld [vmem:[#allocation11 + $0x48] ss:$16 sps:$4 sm:$0xff]  }
 0x100   :  { %1541 = vmatprep.subr.bf16.mxu1 %v5002_v11  ;;  %v4362_v11 = vcombine.low %v6245_v3, %v6245_v3  ;;  %v5175_v3 = vld [vmem:[#allocation11 + $0x3ac] ss:$16 sps:$4 sm:$0xff]  }
 0x101   :  { %1611 = vmatmul.mubr.bf16.vlgmr.msra.gmra.mrb[4].mxu0 %v6253_v30 }
 0x102   :  { %1702 = vmatpush1.bf16.msra.mxu0 %v5095_v31  ;;  %1733 = vmatprep.mubr.bf16.mxu0 %v4363_v5  ;;  %v5078_v5 = vld [vmem:[#allocation11 + $0x3e0] ss:$16 sps:$4 sm:$0xff]   ;;  %v5185_v31 = vld [vmem:[#allocation11 + $0x3e8] ss:$16 sps:$4 sm:$0xff]  }
 0x103   :  { %1542 = vmatpush1.bf16.msra.mxu1 %v5000_v12  ;;  %1703 = vmatprep.subr.bf16.mxu0 %v5103_v32  ;;  %v5155_v12 = vld [vmem:[#allocation11 + $0x348] ss:$16 sps:$4 sm:$0xff]  }
 0x104   :  { %1543 = vmatprep.subr.bf16.mxu1 %v5008_v15  ;;  %v5163_v15 = vld [vmem:[#allocation11 + $0x36c] ss:$16 sps:$4 sm:$0xff]   ;;  %v5110_v32 = vld [vmem:[#allocation11 + $0x68] ss:$16 sps:$4 sm:$0xff]  }
 0x106   :  { %1704 = vmatpush1.bf16.msra.mxu0 %v5101_v35  ;;  %v5233_v35 = vld [vmem:[#allocation11 + $0x608] ss:$16 sps:$4 sm:$0xff]  }
 0x107   :  { %1544 = vmatpush1.bf16.msra.mxu1 %v5006_v16  ;;  %1705 = vmatprep.subr.bf16.mxu0 %v5109_v36  ;;  %v5169_v16 = vld [vmem:[#allocation11 + $0x38c] ss:$16 sps:$4 sm:$0xff]   ;;  %v5116_v36 = vld [vmem:[#allocation11 + $0x88] ss:$16 sps:$4 sm:$0xff]  }
 0x108   :  { %1545 = vmatprep.subr.bf16.mxu1 %v5014_v19  ;;  %v5091_v19 = vld [vmem:[#allocation11 + $0x8] ss:$16 sps:$4 sm:$0xff]  }
 0x10a   :  { %1706 = vmatpush1.bf16.msra.mxu0 %v5107_v39  ;;  %v5130_v39 = vld [vmem:[#allocation11 + $0xcc] ss:$16 sps:$4 sm:$0xff]  }
 0x10b   :  { %1546 = vmatpush1.bf16.msra.mxu1 %v5012_v20  ;;  %1707 = vmatprep.subr.bf16.mxu0 %v5115_v40  ;;  %v5100_v20 = vld [vmem:[#allocation11 + $0x2c] ss:$16 sps:$4 sm:$0xff]   ;;  %v5239_v40 = vld [vmem:[#allocation14] ss:$16 sps:$4 sm:$0xff]  }
 0x10c   :  { %1547 = vmatprep.subr.bf16.mxu1 %v5020_v24  ;;  %v5181_v24 = vld [vmem:[#allocation11 + $0x3cc] ss:$16 sps:$4 sm:$0xff]  }
 0x10e   :  { %1708 = vmatpush1.bf16.msra.mxu0 %v5113_v43  ;;  %v5136_v43 = vld [vmem:[#allocation11 + $0xec] ss:$16 sps:$4 sm:$0xff]  }
 0x10f   :  { %1548 = vmatpush1.bf16.msra.mxu1 %v5018_v25  ;;  %1709 = vmatprep.subr.bf16.mxu0 %v5121_v44  ;;  %v5106_v25 = vld [vmem:[#allocation11 + $0x4c] ss:$16 sps:$4 sm:$0xff]   ;;  %v5245_v44 = vld [vmem:[#allocation14 + $0x20] ss:$16 sps:$4 sm:$0xff]  }
 0x110   :  { %1549 = vmatprep.subr.bf16.mxu1 %v5026_v28  ;;  %v5187_v28 = vld [vmem:[#allocation11 + $0x3ec] ss:$16 sps:$4 sm:$0xff]  }
 0x112   :  { %1710 = vmatpush1.bf16.msra.mxu0 %v5119_v47  ;;  %v5251_v47 = vld [vmem:[#allocation14 + $0x40] ss:$16 sps:$4 sm:$0xff]  }
 0x113   :  { %1550 = vmatpush1.bf16.msra.mxu1 %v5024_v29  ;;  %1711 = vmatprep.subr.bf16.mxu0 %v5127_v48  ;;  %v5112_v29 = vld [vmem:[#allocation11 + $0x6c] ss:$16 sps:$4 sm:$0xff]   ;;  %v5140_v48 = vld [vmem:[#allocation11 + $0x108] ss:$16 sps:$4 sm:$0xff]  }
 0x114   :  { %1551 = vmatprep.subr.bf16.mxu1 %v5032_v33  ;;  %v5235_v33 = vld [vmem:[#allocation11 + $0x60c] ss:$16 sps:$4 sm:$0xff]  }
 0x116   :  { %1712 = vmatpush1.bf16.msra.mxu0 %v5125_v51  ;;  %v5257_v51 = vld [vmem:[#allocation14 + $0x60] ss:$16 sps:$4 sm:$0xff]  }
 0x117   :  { %1552 = vmatpush1.bf16.msra.mxu1 %v5030_v34  ;;  %1713 = vmatprep.subr.bf16.mxu0 %v5133_v52  ;;  %v5118_v34 = vld [vmem:[#allocation11 + $0x8c] ss:$16 sps:$4 sm:$0xff]   ;;  %v5146_v52 = vld [vmem:[#allocation11 + $0x128] ss:$16 sps:$4 sm:$0xff]  }
 0x118   :  { %1553 = vmatprep.subr.bf16.mxu1 %v5038_v37  ;;  %v5241_v37 = vld [vmem:[#allocation14 + $0x4] ss:$16 sps:$4 sm:$0xff]  }
 0x11a   :  { %1714 = vmatpush1.bf16.msra.mxu0 %v5131_v55  ;;  %v5263_v55 = vld [vmem:[#allocation14 + $0x80] ss:$16 sps:$4 sm:$0xff]  }
 0x11b   :  { %1554 = vmatpush1.bf16.msra.mxu1 %v5036_v38  ;;  %1715 = vmatprep.subr.bf16.mxu0 %v5139_v56  ;;  %v5122_v38 = vld [vmem:[#allocation11 + $0xa8] ss:$16 sps:$4 sm:$0xff]  }
 0x11c   :  { %1555 = vmatprep.subr.bf16.mxu1 %v5044_v41  ;;  %v5128_v41 = vld [vmem:[#allocation11 + $0xc8] ss:$16 sps:$4 sm:$0xff]  }
 0x11d   :  { %v5152_v56 = vld [vmem:[#allocation11 + $0x148] ss:$16 sps:$4 sm:$0xff]  }
 0x11e   :  { %1716 = vmatpush1.bf16.msra.mxu0 %v5137_v59  ;;  %v5269_v59 = vld [vmem:[#allocation14 + $0xa0] ss:$16 sps:$4 sm:$0xff]  }
 0x11f   :  { %1556 = vmatpush1.bf16.msra.mxu1 %v5042_v42  ;;  %1717 = vmatprep.subr.bf16.mxu0 %v5145_v60  ;;  %v5247_v42 = vld [vmem:[#allocation14 + $0x24] ss:$16 sps:$4 sm:$0xff]   ;;  %v5158_v60 = vld [vmem:[#allocation11 + $0x168] ss:$16 sps:$4 sm:$0xff]  }
 0x120   :  { %1557 = vmatprep.subr.bf16.mxu1 %v5050_v45  ;;  %v5134_v45 = vld [vmem:[#allocation11 + $0xe8] ss:$16 sps:$4 sm:$0xff]  }
 0x122   :  { %1718 = vmatpush1.bf16.msra.mxu0 %v5143_v1  ;;  %v5275_v1 = vld [vmem:[#allocation14 + $0xc0] ss:$16 sps:$4 sm:$0xff]  }
 0x123   :  { %1558 = vmatpush1.bf16.msra.mxu1 %v5048_v46  ;;  %1719 = vmatprep.subr.bf16.mxu0 %v5151_v2  ;;  %v5142_v46 = vld [vmem:[#allocation11 + $0x10c] ss:$16 sps:$4 sm:$0xff]   ;;  %v5164_v2 = vld [vmem:[#allocation11 + $0x188] ss:$16 sps:$4 sm:$0xff]  }
 0x124   :  { %1559 = vmatprep.subr.bf16.mxu1 %v5056_v49  ;;  %v5148_v49 = vld [vmem:[#allocation11 + $0x12c] ss:$16 sps:$4 sm:$0xff]  }
 0x126   :  { %1720 = vmatpush1.bf16.msra.mxu0 %v5149_v6  ;;  %v5281_v6 = vld [vmem:[#allocation14 + $0xe0] ss:$16 sps:$4 sm:$0xff]  }
 0x127   :  { %1560 = vmatpush1.bf16.msra.mxu1 %v5054_v50  ;;  %1721 = vmatprep.subr.bf16.mxu0 %v5157_v7  ;;  %v5259_v50 = vld [vmem:[#allocation14 + $0x64] ss:$16 sps:$4 sm:$0xff]   ;;  %v5170_v7 = vld [vmem:[#allocation11 + $0x1a8] ss:$16 sps:$4 sm:$0xff]  }
 0x128   :  { %1561 = vmatprep.subr.bf16.mxu1 %v5062_v53  ;;  %v5154_v53 = vld [vmem:[#allocation11 + $0x14c] ss:$16 sps:$4 sm:$0xff]  }
 0x12a   :  { %1722 = vmatpush1.bf16.msra.mxu0 %v5155_v12  ;;  %v5176_v12 = vld [vmem:[#allocation11 + $0x1c8] ss:$16 sps:$4 sm:$0xff]  }
 0x12b   :  { %1562 = vmatpush1.bf16.msra.mxu1 %v5060_v54  ;;  %1723 = vmatprep.subr.bf16.mxu0 %v5163_v15  ;;  %v5265_v54 = vld [vmem:[#allocation14 + $0x84] ss:$16 sps:$4 sm:$0xff]   ;;  %v5293_v15 = vld [vmem:[#allocation14 + $0x120] ss:$16 sps:$4 sm:$0xff]  }
 0x12c   :  { %1563 = vmatprep.subr.bf16.mxu1 %v5068_v57  ;;  %v5160_v57 = vld [vmem:[#allocation11 + $0x16c] ss:$16 sps:$4 sm:$0xff]  }
 0x12e   :  { %1724 = vmatpush1.bf16.msra.mxu0 %v5161_v14  ;;  %v5184_v14 = vld [vmem:[#allocation11 + $0x1ec] ss:$16 sps:$4 sm:$0xff]  }
 0x12f   :  { %1564 = vmatpush1.bf16.msra.mxu1 %v5066_v58  ;;  %1725 = vmatprep.subr.bf16.mxu0 %v5169_v16  ;;  %v5271_v58 = vld [vmem:[#allocation14 + $0xa4] ss:$16 sps:$4 sm:$0xff]   ;;  %v5182_v16 = vld [vmem:[#allocation11 + $0x1e8] ss:$16 sps:$4 sm:$0xff]  }
 0x130   :  { %1565 = vmatprep.subr.bf16.mxu1 %v5074_v61  ;;  %v5277_v61 = vld [vmem:[#allocation14 + $0xc4] ss:$16 sps:$4 sm:$0xff]  }
 0x132   :  { %1726 = vmatpush1.bf16.msra.mxu0 %v5167_v18  ;;  %v5190_v18 = vld [vmem:[#allocation11 + $0x40c] ss:$16 sps:$4 sm:$0xff]  }
 0x133   :  { %1566 = vmatpush1.bf16.msra.mxu1 %v5072_v62  ;;  %1727 = vmatprep.subr.bf16.mxu0 %v5175_v3  ;;  %v5166_v62 = vld [vmem:[#allocation11 + $0x18c] ss:$16 sps:$4 sm:$0xff]   ;;  %v5188_v3 = vld [vmem:[#allocation11 + $0x408] ss:$16 sps:$4 sm:$0xff]  }
 0x134   :  { %1567 = vmatprep.subr.bf16.mxu1 %v5080_v4  ;;  %v5283_v4 = vld [vmem:[#allocation14 + $0xe4] ss:$16 sps:$4 sm:$0xff]  }
 0x136   :  { %1728 = vmatpush1.bf16.msra.mxu0 %v5173_v22  ;;  %v5191_v22 = vld [vmem:[#allocation11 + $0x428] ss:$16 sps:$4 sm:$0xff]  }
 0x137   :  { %1568 = vmatpush1.bf16.msra.mxu1 %v5078_v5  ;;  %1729 = vmatprep.subr.bf16.mxu0 %v5181_v24  ;;  %v5172_v5 = vld [vmem:[#allocation11 + $0x1ac] ss:$16 sps:$4 sm:$0xff]   ;;  %v5194_v24 = vld [vmem:[#allocation11 + $0x448] ss:$16 sps:$4 sm:$0xff]  }
 0x138   :  { %1619 = vmatprep.subr.bf16.mxu1 %v5088_v8  ;;  %v5289_v8 = vld [vmem:[#allocation14 + $0x104] ss:$16 sps:$4 sm:$0xff]  }
 0x13a   :  { %1570 = vmatmul.mubr.bf16.vlgmr.msra.gmra.mrb[8].mxu1 %v4362_v11  ;;  %1730 = vmatpush1.bf16.msra.mxu0 %v5179_v26  ;;  %v5197_v26 = vld [vmem:[#allocation11 + $0x468] ss:$16 sps:$4 sm:$0xff]  }
 0x13b   :  { %1620 = vmatpush1.bf16.msra.mxu1 %v5086_v10  ;;  %1651 = vmatprep.mubr.bf16.mxu1 %v6015_v0  ;;  %v5178_v10 = vld [vmem:[#allocation11 + $0x1cc] ss:$16 sps:$4 sm:$0xff]  }
 0x13c   :  { %1660 = vmatprep.subr.bf16.mxu1 %v5093_v13  ;;  %1731 = vmatprep.subr.bf16.mxu0 %v5187_v28  ;;  %v5295_v13 = vld [vmem:[#allocation14 + $0x124] ss:$16 sps:$4 sm:$0xff]  }
 0x13e   :  { %1732 = vmatpush1.bf16.msra.mxu0 %v5185_v31  ;;  %v5307_v31 = vld [vmem:[#allocation14 + $0x164] ss:$16 sps:$4 sm:$0xff]  }
 0x13f   :  { %1783 = vmatprep.subr.bf16.mxu0 %v5235_v33  ;;  %v5305_v33 = vld [vmem:[#allocation14 + $0x160] ss:$16 sps:$4 sm:$0xff]  }
 0x141   :  { %1734 = vmatmul.mubr.bf16.vlgmr.msra.gmra.mrb[8].mxu0 %v4362_v11  ;;  %v5287_v11 = vld [vmem:[#allocation14 + $0x100] ss:$16 sps:$4 sm:$0xff]  }
 0x142   :  { %4563 = vmatmul.mubr.msk.bf16.vlgmr.msra.gmra.mrb[12].mxu1 %vm403_vm0, %v5094_v17  ;;  %1784 = vmatpush1.bf16.msra.mxu0 %v5233_v35  ;;  %v5203_v35 = vld [vmem:[#allocation11 + $0x4a8] ss:$16 sps:$4 sm:$0xff]  }
 0x143   :  { %1661 = vmatpush1.bf16.msra.mxu1 %v5091_v19  ;;  %1692 = vmatprep.mubr.bf16.mxu1 %v6237_v21  ;;  %v5124_v21 = vld [vmem:[#allocation11 + $0xac] ss:$16 sps:$4 sm:$0xff]   ;;  %v5299_v19 = vld [vmem:[#allocation14 + $0x140] ss:$16 sps:$4 sm:$0xff]  }
 0x144   :  { %1662 = vmatprep.subr.bf16.mxu1 %v5100_v20  ;;  %1815 = vmatprep.mubr.bf16.mxu0 %v6015_v0  ;;  %v5253_v0 = vld [vmem:[#allocation14 + $0x44] ss:$16 sps:$4 sm:$0xff]   ;;  %v5193_v20 = vld [vmem:[#allocation11 + $0x42c] ss:$16 sps:$4 sm:$0xff]  }
 0x145   :  { %2652 = vmatprep.subr.bf16.mxu0 %v5241_v37  ;;  %v5208_v37 = vld [vmem:[#allocation11 + $0x4cc] ss:$16 sps:$4 sm:$0xff]  }
 0x147   :  { %1663 = vmatpush1.bf16.msra.mxu1 %v5098_v23  ;;  %v5196_v23 = vld [vmem:[#allocation11 + $0x44c] ss:$16 sps:$4 sm:$0xff]  }
 0x148   :  { %1664 = vmatprep.subr.bf16.mxu1 %v5106_v25  ;;  %v5199_v25 = vld [vmem:[#allocation11 + $0x46c] ss:$16 sps:$4 sm:$0xff]  }
 0x149   :  { %4564 = vmatmul.mubr.msk.bf16.vlgmr.msra.gmra.mrb[12].mxu0 %vm403_vm0, %v5094_v17  ;;  %v5301_v17 = vld [vmem:[#allocation14 + $0x144] ss:$16 sps:$4 sm:$0xff]  }
 0x14a   :  { %2653 = vmatpush1.bf16.msra.mxu0 %v5239_v40  ;;  %v5317_v40 = vld [vmem:[#allocation14 + $0x1a0] ss:$16 sps:$4 sm:$0xff]  }
 0x14b   :  { %1665 = vmatpush1.bf16.msra.mxu1 %v5104_v27  ;;  %2654 = vmatprep.subr.bf16.mxu0 %v5247_v42  ;;  %v5202_v27 = vld [vmem:[#allocation11 + $0x48c] ss:$16 sps:$4 sm:$0xff]   ;;  %v5209_v42 = vld [vmem:[#allocation11 + $0x4e8] ss:$16 sps:$4 sm:$0xff]  }
 0x14c   :  { %1666 = vmatprep.subr.bf16.mxu1 %v5112_v29  ;;  %v5200_v29 = vld [vmem:[#allocation11 + $0x488] ss:$16 sps:$4 sm:$0xff]  }
 0x14e   :  { %2655 = vmatpush1.bf16.msra.mxu0 %v5245_v44  ;;  %v5214_v44 = vld [vmem:[#allocation11 + $0x50c] ss:$16 sps:$4 sm:$0xff]  }
 0x14f   :  { %1667 = vmatpush1.bf16.msra.mxu1 %v5110_v32  ;;  %2656 = vmatprep.subr.bf16.mxu0 %v5253_v0  ;;  %v5331_v0 = vld [vmem:[#allocation14 + $0x1e4] ss:$16 sps:$4 sm:$0xff]  }
 0x150   :  { %1668 = vmatprep.subr.bf16.mxu1 %v5118_v34 }
 0x152   :  { %2657 = vmatpush1.bf16.msra.mxu0 %v5251_v47  ;;  %v5217_v47 = vld [vmem:[#allocation11 + $0x52c] ss:$16 sps:$4 sm:$0xff]  }
 0x153   :  { %1669 = vmatpush1.bf16.msra.mxu1 %v5116_v36  ;;  %2658 = vmatprep.subr.bf16.mxu0 %v5259_v50  ;;  %v5311_v36 = vld [vmem:[#allocation14 + $0x180] ss:$16 sps:$4 sm:$0xff]   ;;  %v5220_v50 = vld [vmem:[#allocation11 + $0x54c] ss:$16 sps:$4 sm:$0xff]  }
 0x154   :  { %1670 = vmatprep.subr.bf16.mxu1 %v5124_v21  ;;  %v5313_v21 = vld [vmem:[#allocation14 + $0x184] ss:$16 sps:$4 sm:$0xff]  }
 0x156   :  { %2659 = vmatpush1.bf16.msra.mxu0 %v5257_v51 }
 0x157   :  { %1671 = vmatpush1.bf16.msra.mxu1 %v5122_v38  ;;  %2660 = vmatprep.subr.bf16.mxu0 %v5265_v54  ;;  %v5319_v38 = vld [vmem:[#allocation14 + $0x1a4] ss:$16 sps:$4 sm:$0xff]   ;;  %v5223_v54 = vld [vmem:[#allocation11 + $0x56c] ss:$16 sps:$4 sm:$0xff]  }
 0x158   :  { %1672 = vmatprep.subr.bf16.mxu1 %v5130_v39  ;;  %v5206_v39 = vld [vmem:[#allocation11 + $0x4c8] ss:$16 sps:$4 sm:$0xff]  }
 0x15a   :  { %2661 = vmatpush1.bf16.msra.mxu0 %v5263_v55 }
 0x15b   :  { %1673 = vmatpush1.bf16.msra.mxu1 %v5128_v41  ;;  %2662 = vmatprep.subr.bf16.mxu0 %v5271_v58  ;;  %v5211_v41 = vld [vmem:[#allocation11 + $0x4ec] ss:$16 sps:$4 sm:$0xff]  }
 0x15c   :  { %1674 = vmatprep.subr.bf16.mxu1 %v5136_v43  ;;  %v5325_v43 = vld [vmem:[#allocation14 + $0x1c4] ss:$16 sps:$4 sm:$0xff]   ;;  %v5226_v58 = vld [vmem:[#allocation11 + $0x58c] ss:$16 sps:$4 sm:$0xff]  }
 0x15e   :  { %2663 = vmatpush1.bf16.msra.mxu0 %v5269_v59  ;;  %v5224_v59 = vld [vmem:[#allocation11 + $0x588] ss:$16 sps:$4 sm:$0xff]  }
 0x15f   :  { %1675 = vmatpush1.bf16.msra.mxu1 %v5134_v45  ;;  %2664 = vmatprep.subr.bf16.mxu0 %v5277_v61  ;;  %v5323_v45 = vld [vmem:[#allocation14 + $0x1c0] ss:$16 sps:$4 sm:$0xff]   ;;  %v5227_v61 = vld [vmem:[#allocation11 + $0x5a8] ss:$16 sps:$4 sm:$0xff]  }
 0x160   :  { %1676 = vmatprep.subr.bf16.mxu1 %v5142_v46  ;;  %v5212_v46 = vld [vmem:[#allocation11 + $0x508] ss:$16 sps:$4 sm:$0xff]  }
 0x162   :  { %2665 = vmatpush1.bf16.msra.mxu0 %v5275_v1  ;;  %v5230_v1 = vld [vmem:[#allocation11 + $0x5c8] ss:$16 sps:$4 sm:$0xff]  }
 0x163   :  { %1677 = vmatpush1.bf16.msra.mxu1 %v5140_v48  ;;  %2666 = vmatprep.subr.bf16.mxu0 %v5283_v4  ;;  %v5329_v48 = vld [vmem:[#allocation14 + $0x1e0] ss:$16 sps:$4 sm:$0xff]   ;;  %v5236_v4 = vld [vmem:[#allocation11 + $0x5e8] ss:$16 sps:$4 sm:$0xff]  }
 0x164   :  { %1678 = vmatprep.subr.bf16.mxu1 %v5148_v49  ;;  %v5215_v49 = vld [vmem:[#allocation11 + $0x528] ss:$16 sps:$4 sm:$0xff]  }
 0x166   :  { %2667 = vmatpush1.bf16.msra.mxu0 %v5281_v6  ;;  %v5242_v6 = vld [vmem:[#allocation14 + $0x8] ss:$16 sps:$4 sm:$0xff]  }
 0x167   :  { %1679 = vmatpush1.bf16.msra.mxu1 %v5146_v52  ;;  %2668 = vmatprep.subr.bf16.mxu0 %v5289_v8  ;;  %v5218_v52 = vld [vmem:[#allocation11 + $0x548] ss:$16 sps:$4 sm:$0xff]  }
 0x168   :  { %1680 = vmatprep.subr.bf16.mxu1 %v5154_v53  ;;  %v5248_v8 = vld [vmem:[#allocation14 + $0x28] ss:$16 sps:$4 sm:$0xff]  }
 0x16a   :  { %2669 = vmatpush1.bf16.msra.mxu0 %v5287_v11  ;;  %v5254_v11 = vld [vmem:[#allocation14 + $0x48] ss:$16 sps:$4 sm:$0xff]  }
 0x16b   :  { %1681 = vmatpush1.bf16.msra.mxu1 %v5152_v56  ;;  %2670 = vmatprep.subr.bf16.mxu0 %v5295_v13  ;;  %v5260_v13 = vld [vmem:[#allocation14 + $0x68] ss:$16 sps:$4 sm:$0xff]  }
 0x16c   :  { %1682 = vmatprep.subr.bf16.mxu1 %v5160_v57  ;;  %v5221_v57 = vld [vmem:[#allocation11 + $0x568] ss:$16 sps:$4 sm:$0xff]  }
 0x16e   :  { %2671 = vmatpush1.bf16.msra.mxu0 %v5293_v15 }
 0x16f   :  { %1683 = vmatpush1.bf16.msra.mxu1 %v5158_v60  ;;  %2672 = vmatprep.subr.bf16.mxu0 %v5301_v17  ;;  %v5229_v60 = vld [vmem:[#allocation11 + $0x5ac] ss:$16 sps:$4 sm:$0xff]  }
 0x170   :  { %1684 = vmatprep.subr.bf16.mxu1 %v5166_v62  ;;  %v5232_v62 = vld [vmem:[#allocation11 + $0x5cc] ss:$16 sps:$4 sm:$0xff]  }
 0x172   :  { %2673 = vmatpush1.bf16.msra.mxu0 %v5299_v19 }
 0x173   :  { %1685 = vmatpush1.bf16.msra.mxu1 %v5164_v2  ;;  %2674 = vmatprep.subr.bf16.mxu0 %v5307_v31  ;;  %v5238_v2 = vld [vmem:[#allocation11 + $0x5ec] ss:$16 sps:$4 sm:$0xff]   ;;  %v5290_v31 = vld [vmem:[#allocation14 + $0x108] ss:$16 sps:$4 sm:$0xff]  }
 0x174   :  { %1686 = vmatprep.subr.bf16.mxu1 %v5172_v5  ;;  %v5244_v5 = vld [vmem:[#allocation14 + $0xc] ss:$16 sps:$4 sm:$0xff]  }
 0x176   :  { %2675 = vmatpush1.bf16.msra.mxu0 %v5305_v33  ;;  %v5296_v33 = vld [vmem:[#allocation14 + $0x128] ss:$16 sps:$4 sm:$0xff]  }
 0x177   :  { %1687 = vmatpush1.bf16.msra.mxu1 %v5170_v7  ;;  %2676 = vmatprep.subr.bf16.mxu0 %v5313_v21  ;;  %v5250_v7 = vld [vmem:[#allocation14 + $0x2c] ss:$16 sps:$4 sm:$0xff]   ;;  %v5302_v21 = vld [vmem:[#allocation14 + $0x148] ss:$16 sps:$4 sm:$0xff]  }
 0x178   :  { %1688 = vmatprep.subr.bf16.mxu1 %v5178_v10  ;;  %v5256_v10 = vld [vmem:[#allocation14 + $0x4c] ss:$16 sps:$4 sm:$0xff]  }
 0x17a   :  { %2677 = vmatpush1.bf16.msra.mxu0 %v5311_v36 }
 0x17b   :  { %1689 = vmatpush1.bf16.msra.mxu1 %v5176_v12  ;;  %2678 = vmatprep.subr.bf16.mxu0 %v5319_v38  ;;  %v5262_v12 = vld [vmem:[#allocation14 + $0x6c] ss:$16 sps:$4 sm:$0xff]  }
 0x17c   :  { %1690 = vmatprep.subr.bf16.mxu1 %v5184_v14  ;;  %v5268_v14 = vld [vmem:[#allocation14 + $0x8c] ss:$16 sps:$4 sm:$0xff]  }
 0x17d   :  { %v5310_v38 = vld [vmem:[#allocation14 + $0x16c] ss:$16 sps:$4 sm:$0xff]  }
 0x17e   :  { %2679 = vmatpush1.bf16.msra.mxu0 %v5317_v40  ;;  %v5316_v40 = vld [vmem:[#allocation14 + $0x18c] ss:$16 sps:$4 sm:$0xff]  }
 0x17f   :  { %1691 = vmatpush1.bf16.msra.mxu1 %v5182_v16  ;;  %2680 = vmatprep.subr.bf16.mxu0 %v5325_v43  ;;  %v5320_v43 = vld [vmem:[#allocation14 + $0x1a8] ss:$16 sps:$4 sm:$0xff]  }
 0x180   :  { %1742 = vmatprep.subr.bf16.mxu1 %v5190_v18 }
 0x182   :  { %1693 = vmatmul.mubr.bf16.vlgmr.msra.gmra.mrb[16].mxu1 %v6243_v63  ;;  %v5205_v63 = vld [vmem:[#allocation11 + $0x4ac] ss:$16 sps:$4 sm:$0xff]   ;;  %2681 = vmatpush1.bf16.msra.mxu0 %v5323_v45  ;;  %v5326_v45 = vld [vmem:[#allocation14 + $0x1c8] ss:$16 sps:$4 sm:$0xff]  }
 0x183   :  { %1743 = vmatpush1.bf16.msra.mxu1 %v5188_v3  ;;  %1774 = vmatprep.mubr.bf16.mxu1 %v6250_v9 }
 0x184   :  { %1744 = vmatprep.subr.bf16.mxu1 %v5193_v20  ;;  %2682 = vmatprep.subr.bf16.mxu0 %v5331_v0  ;;  %v5274_v20 = vld [vmem:[#allocation14 + $0xac] ss:$16 sps:$4 sm:$0xff]   ;;  %v5332_v0 = vld [vmem:[#allocation14 + $0x1e8] ss:$16 sps:$4 sm:$0xff]  }
 0x186   :  { %2683 = vmatpush1.bf16.msra.mxu0 %v5329_v48  ;;  %v1826_v48 = vlaneseq }
 0x187   :  { %1745 = vmatpush1.bf16.msra.mxu1 %v5191_v22  ;;  %v5272_v22 = vld [vmem:[#allocation14 + $0xa8] ss:$16 sps:$4 sm:$0xff]  }
 0x188   :  { %1746 = vmatprep.subr.bf16.mxu1 %v5196_v23  ;;  %v5280_v23 = vld [vmem:[#allocation14 + $0xcc] ss:$16 sps:$4 sm:$0xff]  }
 0x18b   :  { %1747 = vmatpush1.bf16.msra.mxu1 %v5194_v24  ;;  %v5278_v24 = vld [vmem:[#allocation14 + $0xc8] ss:$16 sps:$4 sm:$0xff]  }
 0x18c   :  { %1748 = vmatprep.subr.bf16.mxu1 %v5199_v25  ;;  %v5286_v25 = vld [vmem:[#allocation14 + $0xec] ss:$16 sps:$4 sm:$0xff]  }
 0x18d   :  { %v6265_v28 = vpop.f32.mrb[0].mxu1 }
 0x18e   :  { %v6267_v32 = vpop.f32.mrb[1].mxu1 }
 0x18f   :  { %1749 = vmatpush1.bf16.msra.mxu1 %v5197_v26  ;;  %v486_v34 = vpop.f32.mrb[2].mxu1  ;;  %v5337_v26 = vld [vmem:[#allocation14 + $0x204] ss:$16 sps:$4 sm:$0xff]  }
 0x190   :  { %v487_v9 = vpop.f32.mrb[3].mxu1  ;;  %1750 = vmatprep.subr.bf16.mxu1 %v5202_v27  ;;  %v5284_v27 = vld [vmem:[#allocation14 + $0xe8] ss:$16 sps:$4 sm:$0xff]   ;;  %2693 = vmatprep.subr.bf16.mxu0 %v5337_v26  ;;  %v5304_v34 = vld [vmem:[#allocation14 + $0x14c] ss:$16 sps:$4 sm:$0xff]  }
 0x193   :  { %1751 = vmatpush1.bf16.msra.mxu1 %v5200_v29  ;;  %v5292_v29 = vld [vmem:[#allocation14 + $0x10c] ss:$16 sps:$4 sm:$0xff]  }
 0x194   :  { %1752 = vmatprep.subr.bf16.mxu1 %v5205_v63  ;;  %v441_v51 = vpop.f32.mrb[0].mxu0  ;;  %v5298_v63 = vld [vmem:[#allocation14 + $0x12c] ss:$16 sps:$4 sm:$0xff]  }
 0x195   :  { %v443_v53 = vpop.f32.mrb[1].mxu0 }
 0x196   :  { %v445_v55 = vpop.f32.mrb[2].mxu0 }
 0x197   :  { %1753 = vmatpush1.bf16.msra.mxu1 %v5203_v35  ;;  %v446_v56 = vpop.f32.mrb[3].mxu0 }
 0x198   :  { %1754 = vmatprep.subr.bf16.mxu1 %v5208_v37 }
 0x19b   :  { %1755 = vmatpush1.bf16.msra.mxu1 %v5206_v39  ;;  %v5308_v39 = vld [vmem:[#allocation14 + $0x168] ss:$16 sps:$4 sm:$0xff]  }
 0x19c   :  { %1756 = vmatprep.subr.bf16.mxu1 %v5211_v41  ;;  %v5314_v41 = vld [vmem:[#allocation14 + $0x188] ss:$16 sps:$4 sm:$0xff]  }
 0x19f   :  { %1757 = vmatpush1.bf16.msra.mxu1 %v5209_v42  ;;  %v5322_v42 = vld [vmem:[#allocation14 + $0x1ac] ss:$16 sps:$4 sm:$0xff]  }
 0x1a0   :  { %1758 = vmatprep.subr.bf16.mxu1 %v5214_v44  ;;  %v5328_v44 = vld [vmem:[#allocation14 + $0x1cc] ss:$16 sps:$4 sm:$0xff]  }
 0x1a3   :  { %1759 = vmatpush1.bf16.msra.mxu1 %v5212_v46  ;;  %v5334_v46 = vld [vmem:[#allocation14 + $0x1ec] ss:$16 sps:$4 sm:$0xff]  }
 0x1a4   :  { %1760 = vmatprep.subr.bf16.mxu1 %v5217_v47  ;;  %v5340_v47 = vld [vmem:[#allocation14 + $0x20c] ss:$16 sps:$4 sm:$0xff]  }
 0x1a7   :  { %1761 = vmatpush1.bf16.msra.mxu1 %v5215_v49  ;;  %v6274_v49 = vshrl.u32 %v1826_v48, 7  ;;  %v5374_v48 = vld [vmem:[#allocation14 + $0x2c8] ss:$16 sps:$4 sm:$0xff]  }
 0x1a8   :  { %1762 = vmatprep.subr.bf16.mxu1 %v5220_v50 }
 0x1ab   :  { %1763 = vmatpush1.bf16.msra.mxu1 %v5218_v52 }
 0x1ac   :  { %1764 = vmatprep.subr.bf16.mxu1 %v5223_v54 }
 0x1af   :  { %1765 = vmatpush1.bf16.msra.mxu1 %v5221_v57  ;;  %v6279_v57 = vsub.s32 0, %v6274_v49 }
 0x1b0   :  { %1766 = vmatprep.subr.bf16.mxu1 %v5226_v58 }
 0x1b3   :  { %1767 = vmatpush1.bf16.msra.mxu1 %v5224_v59  ;;  %v6284_v59 = vld [vmem:[%s6393_s7] sm:$0xf] }
 0x1b4   :  { %1768 = vmatprep.subr.bf16.mxu1 %v5229_v60  ;;  %v6287_v60 = vsub.s32 1, %v6274_v49 }
 0x1b7   :  { %1769 = vmatpush1.bf16.msra.mxu1 %v5227_v61  ;;  %v1829_v61 = vrot.slane %v6284_v59, %v6279_v57 }
 0x1b8   :  { %1770 = vmatprep.subr.bf16.mxu1 %v5232_v62 }
 0x1bb   :  { %1771 = vmatpush1.bf16.msra.mxu1 %v5230_v1  ;;  %v1833_v1 = vrot.slane %v6284_v59, %v6287_v60 }
 0x1bc   :  { %1772 = vmatprep.subr.bf16.mxu1 %v5238_v2 }
 0x1bf   :  { %1773 = vmatpush1.bf16.msra.mxu1 %v5236_v4 }
 0x1c0   :  { %2734 = vmatprep.subr.bf16.mxu1 %v5244_v5 }
 0x1c2   :  { %1775 = vmatmul.mubr.bf16.vlgmr.msra.gmra.mrb[20].mxu1 %v6253_v30  ;;  %v5266_v30 = vld [vmem:[#allocation14 + $0x88] ss:$16 sps:$4 sm:$0xff]  }
 0x1c3   :  { %2735 = vmatpush1.bf16.msra.mxu1 %v5242_v6 }
 0x1c4   :  { %2736 = vmatprep.subr.bf16.mxu1 %v5250_v7 }
 0x1c7   :  { %2737 = vmatpush1.bf16.msra.mxu1 %v5248_v8 }
 0x1c8   :  { %2738 = vmatprep.subr.bf16.mxu1 %v5256_v10 }
 0x1cb   :  { %2739 = vmatpush1.bf16.msra.mxu1 %v5254_v11 }
 0x1cc   :  { %2740 = vmatprep.subr.bf16.mxu1 %v5262_v12 }
 0x1cd   :  { %v1530_v15 = vpop.f32.mrb[4].mxu1 }
 0x1ce   :  { %v6270_v16 = vadd.f32 %v1530_v15, %v441_v51  ;;  %v1532_v17 = vpop.f32.mrb[5].mxu1 }
 0x1cf   :  { %v6272_v18 = vadd.f32 %v1532_v17, %v443_v53  ;;  %v1534_v19 = vpop.f32.mrb[6].mxu1  ;;  %2741 = vmatpush1.bf16.msra.mxu1 %v5260_v13  ;;  %v5338_v17 = vld [vmem:[#allocation14 + $0x208] ss:$16 sps:$4 sm:$0xff]  }
 0x1d0   :  { %v1535_v3 = vpop.f32.mrb[7].mxu1  ;;  %2742 = vmatprep.subr.bf16.mxu1 %v5268_v14  ;;  %v5343_v19 = vld [vmem:[#allocation14 + $0x224] ss:$16 sps:$4 sm:$0xff]  }
 0x1d1   :  { %v5341_v3 = vld [vmem:[#allocation14 + $0x220] ss:$16 sps:$4 sm:$0xff]  }
 0x1d3   :  { %2743 = vmatpush1.bf16.msra.mxu1 %v5266_v30  ;;  %v5346_v30 = vld [vmem:[#allocation14 + $0x22c] ss:$16 sps:$4 sm:$0xff]  }
 0x1d4   :  { %2744 = vmatprep.subr.bf16.mxu1 %v5274_v20  ;;  %v1612_v9 = vpop.f32.mrb[4].mxu0  ;;  %v5344_v20 = vld [vmem:[#allocation14 + $0x228] ss:$16 sps:$4 sm:$0xff]  }
 0x1d5   :  { %v1614_v35 = vpop.f32.mrb[5].mxu0 }
 0x1d6   :  { %v1616_v36 = vpop.f32.mrb[6].mxu0 }
 0x1d7   :  { %2745 = vmatpush1.bf16.msra.mxu1 %v5272_v22  ;;  %v1617_v37 = vpop.f32.mrb[7].mxu0  ;;  %v5364_v36 = vld [vmem:[#allocation14 + $0x28c] ss:$16 sps:$4 sm:$0xff]  }
 0x1d8   :  { %2746 = vmatprep.subr.bf16.mxu1 %v5280_v23  ;;  %v5349_v23 = vld [vmem:[#allocation14 + $0x244] ss:$16 sps:$4 sm:$0xff]  }
 0x1db   :  { %2747 = vmatpush1.bf16.msra.mxu1 %v5278_v24  ;;  %v5352_v24 = vld [vmem:[#allocation14 + $0x24c] ss:$16 sps:$4 sm:$0xff]  }
 0x1dc   :  { %2748 = vmatprep.subr.bf16.mxu1 %v5286_v25 }
 0x1df   :  { %2749 = vmatpush1.bf16.msra.mxu1 %v5284_v27  ;;  %v5347_v27 = vld [vmem:[#allocation14 + $0x240] ss:$16 sps:$4 sm:$0xff]  }
 0x1e0   :  { %2750 = vmatprep.subr.bf16.mxu1 %v5292_v29  ;;  %v5350_v29 = vld [vmem:[#allocation14 + $0x248] ss:$16 sps:$4 sm:$0xff]  }
 0x1e3   :  { %2751 = vmatpush1.bf16.msra.mxu1 %v5290_v31 }
 0x1e4   :  { %2752 = vmatprep.subr.bf16.mxu1 %v5298_v63  ;;  %v5355_v63 = vld [vmem:[#allocation14 + $0x264] ss:$16 sps:$4 sm:$0xff]  }
 0x1e7   :  { %2753 = vmatpush1.bf16.msra.mxu1 %v5296_v33  ;;  %v5358_v33 = vld [vmem:[#allocation14 + $0x26c] ss:$16 sps:$4 sm:$0xff]  }
 0x1e8   :  { %2754 = vmatprep.subr.bf16.mxu1 %v5304_v34  ;;  %v5353_v34 = vld [vmem:[#allocation14 + $0x260] ss:$16 sps:$4 sm:$0xff]  }
 0x1eb   :  { %2755 = vmatpush1.bf16.msra.mxu1 %v5302_v21 }
 0x1ec   :  { %2756 = vmatprep.subr.bf16.mxu1 %v5310_v38 }
 0x1ef   :  { %2757 = vmatpush1.bf16.msra.mxu1 %v5308_v39  ;;  %v5359_v39 = vld [vmem:[#allocation14 + $0x280] ss:$16 sps:$4 sm:$0xff]  }
 0x1f0   :  { %2758 = vmatprep.subr.bf16.mxu1 %v5316_v40  ;;  %v5362_v40 = vld [vmem:[#allocation14 + $0x288] ss:$16 sps:$4 sm:$0xff]  }
 0x1f3   :  { %2759 = vmatpush1.bf16.msra.mxu1 %v5314_v41 }
 0x1f4   :  { %2760 = vmatprep.subr.bf16.mxu1 %v5322_v42  ;;  %v5367_v42 = vld [vmem:[#allocation14 + $0x2a4] ss:$16 sps:$4 sm:$0xff]  }
 0x1f7   :  { %2761 = vmatpush1.bf16.msra.mxu1 %v5320_v43  ;;  %v5370_v43 = vld [vmem:[#allocation14 + $0x2ac] ss:$16 sps:$4 sm:$0xff]  }
 0x1f8   :  { %2762 = vmatprep.subr.bf16.mxu1 %v5328_v44  ;;  %v5365_v44 = vld [vmem:[#allocation14 + $0x2a0] ss:$16 sps:$4 sm:$0xff]  }
 0x1fb   :  { %2763 = vmatpush1.bf16.msra.mxu1 %v5326_v45  ;;  %v5368_v45 = vld [vmem:[#allocation14 + $0x2a8] ss:$16 sps:$4 sm:$0xff]  }
 0x1fc   :  { %2764 = vmatprep.subr.bf16.mxu1 %v5334_v46  ;;  %v5373_v46 = vld [vmem:[#allocation14 + $0x2c4] ss:$16 sps:$4 sm:$0xff]  }
 0x1ff   :  { %2765 = vmatpush1.bf16.msra.mxu1 %v5332_v0  ;;  %v5376_v0 = vld [vmem:[#allocation14 + $0x2cc] ss:$16 sps:$4 sm:$0xff]  }
 0x200   :  { %2775 = vmatprep.subr.bf16.mxu1 %v5340_v47  ;;  %v5371_v47 = vld [vmem:[#allocation14 + $0x2c0] ss:$16 sps:$4 sm:$0xff]  }
 0x20d   :  { %v1571_v50 = vpop.f32.mrb[8].mxu1 }
 0x20e   :  { %v1572_v51 = vadd.f32 %v1571_v50, %v6270_v16  ;;  %v1573_v52 = vpop.f32.mrb[9].mxu1  ;;  %v5335_v16 = vld [vmem:[#allocation14 + $0x200] ss:$16 sps:$4 sm:$0xff]   ;;  %v5379_v50 = vld [vmem:[#allocation14 + $0x2e4] ss:$16 sps:$4 sm:$0xff]  }
 0x20f   :  { %v1574_v53 = vadd.f32 %v1573_v52, %v6272_v18  ;;  %v1575_v54 = vpop.f32.mrb[10].mxu1  ;;  %v5377_v52 = vld [vmem:[#allocation14 + $0x2e0] ss:$16 sps:$4 sm:$0xff]  }
 0x210   :  { %v1613_v55 = vadd.f32 %v1612_v9, %v1572_v51  ;;  %v1576_v56 = vpop.f32.mrb[11].mxu1  ;;  %v5356_v9 = vld [vmem:[#allocation14 + $0x268] ss:$16 sps:$4 sm:$0xff]   ;;  %v5382_v51 = vld [vmem:[#allocation14 + $0x2ec] ss:$16 sps:$4 sm:$0xff]  }
 0x211   :  { %v1615_v58 = vadd.f32 %v1614_v35, %v1574_v53  ;;  %v5361_v35 = vld [vmem:[#allocation14 + $0x284] ss:$16 sps:$4 sm:$0xff]   ;;  %v5380_v53 = vld [vmem:[#allocation14 + $0x2e8] ss:$16 sps:$4 sm:$0xff]   ;;  %v5383_v56 = vld [vmem:[#allocation14 + $0x300] ss:$16 sps:$4 sm:$0xff]  }
 0x212   :  { %v5385_v54 = vld [vmem:[#allocation14 + $0x304] ss:$16 sps:$4 sm:$0xff]  }
 0x214   :  { %v6293_v22 = vpop.f32.mrb[8].mxu0 }
 0x215   :  { %v1653_v62 = vpop.f32.mrb[12].mxu1  ;;  %v6295_v25 = vpop.f32.mrb[9].mxu0 }
 0x216   :  { %v1654_v2 = vadd.f32 %v1653_v62, %v1613_v55  ;;  %v1655_v4 = vpop.f32.mrb[13].mxu1  ;;  %v1739_v26 = vpop.f32.mrb[10].mxu0  ;;  %v5388_v55 = vld [vmem:[#allocation14 + $0x30c] ss:$16 sps:$4 sm:$0xff]  }
 0x217   :  { %v1656_v5 = vadd.f32 %v1655_v4, %v1615_v58  ;;  %v1657_v6 = vpop.f32.mrb[14].mxu1  ;;  %v1740_v31 = vpop.f32.mrb[11].mxu0  ;;  %v5386_v58 = vld [vmem:[#allocation14 + $0x308] ss:$16 sps:$4 sm:$0xff]   ;;  %v5394_v62 = vld [vmem:[#allocation14 + $0x32c] ss:$16 sps:$4 sm:$0xff]  }
 0x218   :  { %v1846_v7 = vadd.f32 %v1829_v61, %v1654_v2  ;;  %v1658_v8 = vpop.f32.mrb[15].mxu1  ;;  %v5391_v61 = vld [vmem:[#allocation14 + $0x324] ss:$16 sps:$4 sm:$0xff]   ;;  %v5392_v2 = vld [vmem:[#allocation14 + $0x328] ss:$16 sps:$4 sm:$0xff]  }
 0x219   :  { %v1847_v10 = vadd.f32 %v1833_v1, %v1656_v5  ;;  %v5389_v1 = vld [vmem:[#allocation14 + $0x320] ss:$16 sps:$4 sm:$0xff]   ;;  %v5397_v4 = vld [vmem:[#allocation14 + $0x344] ss:$16 sps:$4 sm:$0xff]   ;;  %v5400_v5 = vld [vmem:[#allocation14 + $0x34c] ss:$16 sps:$4 sm:$0xff]  }
 0x21a   :  { %v1850_v11 = vmul.f32 0.2, %v1846_v7  ;;  %v5395_v6 = vld [vmem:[#allocation14 + $0x340] ss:$16 sps:$4 sm:$0xff]   ;;  %v5403_v8 = vld [vmem:[#allocation14 + $0x364] ss:$16 sps:$4 sm:$0xff]  }
 0x21b   :  { %v1851_v12 = vmul.f32 0.2, %v1847_v10  ;;  %v5419_v31 = vld [vmem:[#allocation14 + $0x3c0] ss:$16 sps:$4 sm:$0xff]  }
 0x21c   :  { %v1854_v13 = vmax.f32 %v1846_v7, %v1850_v11  ;;  %v6297_v21 = vpop.f32.mrb[12].mxu0  ;;  %v5398_v7 = vld [vmem:[#allocation14 + $0x348] ss:$16 sps:$4 sm:$0xff]   ;;  %v5401_v11 = vld [vmem:[#allocation14 + $0x360] ss:$16 sps:$4 sm:$0xff]  }
 0x21d   :  { %v1855_v14 = vmax.f32 %v1847_v10, %v1851_v12  ;;  %v6299_v37 = vpop.f32.mrb[13].mxu0  ;;  %v5406_v10 = vld [vmem:[#allocation14 + $0x36c] ss:$16 sps:$4 sm:$0xff]   ;;  %v5404_v12 = vld [vmem:[#allocation14 + $0x368] ss:$16 sps:$4 sm:$0xff]  }
 0x21e   :  { %v1858_v18 = vpack.c.bf16 %v1854_v13, %v1854_v13  ;;  %v1821_v38 = vpop.f32.mrb[14].mxu0  ;;  %v5409_v13 = vld [vmem:[#allocation14 + $0x384] ss:$16 sps:$4 sm:$0xff]  }
 0x21f   :  { %v1859_v15 = vpack.c.bf16 %v1855_v14, %v1855_v14  ;;  %v1822_v41 = vpop.f32.mrb[15].mxu0  ;;  %v5412_v14 = vld [vmem:[#allocation14 + $0x38c] ss:$16 sps:$4 sm:$0xff]   ;;  %v5428_v38 = vld [vmem:[#allocation14 + $0x3e8] ss:$16 sps:$4 sm:$0xff]  }
 0x221   :  { %2684 = vmatprep.mubr.bf16.mxu0 %v1859_v15  ;;  %2766 = vmatprep.mubr.bf16.mxu1 %v1859_v15  ;;  %v5407_v15 = vld [vmem:[#allocation14 + $0x380] ss:$16 sps:$4 sm:$0xff]  }
 0x222   :  { %2685 = vmatmul.mubr.bf16.vlgmr.msra.gmra.mrb[16].mxu0 %v1858_v18  ;;  %2767 = vmatmul.mubr.bf16.vlgmr.msra.gmra.mrb[24].mxu1 %v1858_v18  ;;  %v5418_v18 = vld [vmem:[#allocation14 + $0x3ac] ss:$16 sps:$4 sm:$0xff]  }
 0x223   :  { %2694 = vmatpush1.bf16.msra.mxu0 %v5335_v16  ;;  %2776 = vmatpush1.bf16.msra.mxu1 %v5338_v17  ;;  %v5410_v16 = vld [vmem:[#allocation14 + $0x388] ss:$16 sps:$4 sm:$0xff]   ;;  %v5415_v17 = vld [vmem:[#allocation14 + $0x3a4] ss:$16 sps:$4 sm:$0xff]  }
 0x224   :  { %2695 = vmatprep.subr.bf16.mxu0 %v5343_v19  ;;  %2777 = vmatprep.subr.bf16.mxu1 %v5346_v30  ;;  %v5413_v19 = vld [vmem:[#allocation14 + $0x3a0] ss:$16 sps:$4 sm:$0xff]   ;;  %v5416_v30 = vld [vmem:[#allocation14 + $0x3a8] ss:$16 sps:$4 sm:$0xff]  }
 0x227   :  { %2696 = vmatpush1.bf16.msra.mxu0 %v5341_v3  ;;  %2778 = vmatpush1.bf16.msra.mxu1 %v5344_v20  ;;  %v5421_v3 = vld [vmem:[#allocation14 + $0x3c4] ss:$16 sps:$4 sm:$0xff]   ;;  %v5424_v20 = vld [vmem:[#allocation14 + $0x3cc] ss:$16 sps:$4 sm:$0xff]  }
 0x228   :  { %2697 = vmatprep.subr.bf16.mxu0 %v5349_v23  ;;  %2779 = vmatprep.subr.bf16.mxu1 %v5352_v24 }
 0x22b   :  { %2698 = vmatpush1.bf16.msra.mxu0 %v5347_v27  ;;  %2780 = vmatpush1.bf16.msra.mxu1 %v5350_v29 }
 0x22c   :  { %2699 = vmatprep.subr.bf16.mxu0 %v5355_v63  ;;  %2781 = vmatprep.subr.bf16.mxu1 %v5358_v33  ;;  %v5422_v63 = vld [vmem:[#allocation14 + $0x3c8] ss:$16 sps:$4 sm:$0xff]  }
 0x22f   :  { %2700 = vmatpush1.bf16.msra.mxu0 %v5353_v34  ;;  %2782 = vmatpush1.bf16.msra.mxu1 %v5356_v9  ;;  %v5427_v9 = vld [vmem:[#allocation14 + $0x3e4] ss:$16 sps:$4 sm:$0xff]  }
 0x230   :  { %2701 = vmatprep.subr.bf16.mxu0 %v5361_v35  ;;  %2783 = vmatprep.subr.bf16.mxu1 %v5364_v36  ;;  %v5430_v35 = vld [vmem:[#allocation14 + $0x3ec] ss:$16 sps:$4 sm:$0xff]  }
 0x233   :  { %2702 = vmatpush1.bf16.msra.mxu0 %v5359_v39  ;;  %2784 = vmatpush1.bf16.msra.mxu1 %v5362_v40  ;;  %v5436_v39 = vld [vmem:[#allocation16 + $0xc] ss:$16 sps:$4 sm:$0xff]   ;;  %v6309_v40 = vsub.s32 3, %v6274_v49 }
 0x234   :  { %2703 = vmatprep.subr.bf16.mxu0 %v5367_v42  ;;  %2785 = vmatprep.subr.bf16.mxu1 %v5370_v43 }
 0x237   :  { %2704 = vmatpush1.bf16.msra.mxu0 %v5365_v44  ;;  %2786 = vmatpush1.bf16.msra.mxu1 %v5368_v45  ;;  %v1841_v45 = vrot.slane %v6284_v59, %v6309_v40 }
 0x238   :  { %2705 = vmatprep.subr.bf16.mxu0 %v5373_v46  ;;  %2787 = vmatprep.subr.bf16.mxu1 %v5376_v0 }
 0x23b   :  { %2706 = vmatpush1.bf16.msra.mxu0 %v5371_v47  ;;  %2788 = vmatpush1.bf16.msra.mxu1 %v5374_v48 }
 0x23c   :  { %2707 = vmatprep.subr.bf16.mxu0 %v5379_v50  ;;  %2789 = vmatprep.subr.bf16.mxu1 %v5382_v51 }
 0x23f   :  { %2708 = vmatpush1.bf16.msra.mxu0 %v5377_v52  ;;  %2790 = vmatpush1.bf16.msra.mxu1 %v5380_v53 }
 0x240   :  { %2709 = vmatprep.subr.bf16.mxu0 %v5385_v54  ;;  %2791 = vmatprep.subr.bf16.mxu1 %v5388_v55 }
 0x243   :  { %2710 = vmatpush1.bf16.msra.mxu0 %v5383_v56  ;;  %2792 = vmatpush1.bf16.msra.mxu1 %v5386_v58  ;;  %v5431_v56 = vld [vmem:[#allocation16] ss:$16 sps:$4 sm:$0xff]   ;;  %v5434_v58 = vld [vmem:[#allocation16 + $0x8] ss:$16 sps:$4 sm:$0xff]  }
 0x244   :  { %2711 = vmatprep.subr.bf16.mxu0 %v5391_v61  ;;  %2793 = vmatprep.subr.bf16.mxu1 %v5394_v62  ;;  %v5439_v62 = vld [vmem:[#allocation16 + $0x24] ss:$16 sps:$4 sm:$0xff]  }
 0x247   :  { %2712 = vmatpush1.bf16.msra.mxu0 %v5389_v1  ;;  %2794 = vmatpush1.bf16.msra.mxu1 %v5392_v2  ;;  %v5442_v1 = vld [vmem:[#allocation16 + $0x2c] ss:$16 sps:$4 sm:$0xff]  }
 0x248   :  { %2713 = vmatprep.subr.bf16.mxu0 %v5397_v4  ;;  %2795 = vmatprep.subr.bf16.mxu1 %v5400_v5  ;;  %v5448_v2 = vld [vmem:[#allocation16 + $0x4c] ss:$16 sps:$4 sm:$0xff]   ;;  %v5443_v4 = vld [vmem:[#allocation16 + $0x40] ss:$16 sps:$4 sm:$0xff]   ;;  %v5446_v5 = vld [vmem:[#allocation16 + $0x48] ss:$16 sps:$4 sm:$0xff]  }
 0x24b   :  { %2714 = vmatpush1.bf16.msra.mxu0 %v5395_v6  ;;  %2796 = vmatpush1.bf16.msra.mxu1 %v5398_v7  ;;  %v5451_v6 = vld [vmem:[#allocation16 + $0x64] ss:$16 sps:$4 sm:$0xff]   ;;  %v5454_v7 = vld [vmem:[#allocation16 + $0x6c] ss:$16 sps:$4 sm:$0xff]  }
 0x24c   :  { %2715 = vmatprep.subr.bf16.mxu0 %v5403_v8  ;;  %2797 = vmatprep.subr.bf16.mxu1 %v5406_v10  ;;  %v5449_v8 = vld [vmem:[#allocation16 + $0x60] ss:$16 sps:$4 sm:$0xff]   ;;  %v5452_v10 = vld [vmem:[#allocation16 + $0x68] ss:$16 sps:$4 sm:$0xff]  }
 0x24f   :  { %2716 = vmatpush1.bf16.msra.mxu0 %v5401_v11  ;;  %2798 = vmatpush1.bf16.msra.mxu1 %v5404_v12  ;;  %v5457_v11 = vld [vmem:[#allocation16 + $0x84] ss:$16 sps:$4 sm:$0xff]   ;;  %v5460_v12 = vld [vmem:[#allocation16 + $0x8c] ss:$16 sps:$4 sm:$0xff]  }
 0x250   :  { %2717 = vmatprep.subr.bf16.mxu0 %v5409_v13  ;;  %2799 = vmatprep.subr.bf16.mxu1 %v5412_v14  ;;  %v5455_v13 = vld [vmem:[#allocation16 + $0x80] ss:$16 sps:$4 sm:$0xff]   ;;  %v5458_v14 = vld [vmem:[#allocation16 + $0x88] ss:$16 sps:$4 sm:$0xff]  }
 0x253   :  { %2718 = vmatpush1.bf16.msra.mxu0 %v5407_v15  ;;  %2800 = vmatpush1.bf16.msra.mxu1 %v5410_v16  ;;  %v5463_v15 = vld [vmem:[#allocation16 + $0xa4] ss:$16 sps:$4 sm:$0xff]   ;;  %v5466_v16 = vld [vmem:[#allocation16 + $0xac] ss:$16 sps:$4 sm:$0xff]  }
 0x254   :  { %2719 = vmatprep.subr.bf16.mxu0 %v5415_v17  ;;  %2801 = vmatprep.subr.bf16.mxu1 %v5418_v18  ;;  %v5461_v17 = vld [vmem:[#allocation16 + $0xa0] ss:$16 sps:$4 sm:$0xff]   ;;  %v5464_v18 = vld [vmem:[#allocation16 + $0xa8] ss:$16 sps:$4 sm:$0xff]  }
 0x255   :  { %v1694_v23 = vpop.f32.mrb[16].mxu1 }
 0x256   :  { %v1695_v24 = vadd.f32 %v1694_v23, %v6265_v28  ;;  %v1696_v26 = vpop.f32.mrb[17].mxu1  ;;  %v5425_v28 = vld [vmem:[#allocation14 + $0x3e0] ss:$16 sps:$4 sm:$0xff]   ;;  %v5475_v23 = vld [vmem:[#allocation16 + $0xe4] ss:$16 sps:$4 sm:$0xff]  }
 0x257   :  { %v1697_v27 = vadd.f32 %v1696_v26, %v6267_v32  ;;  %v1698_v29 = vpop.f32.mrb[18].mxu1  ;;  %2720 = vmatpush1.bf16.msra.mxu0 %v5413_v19  ;;  %2802 = vmatpush1.bf16.msra.mxu1 %v5416_v30  ;;  %v5433_v32 = vld [vmem:[#allocation16 + $0x4] ss:$16 sps:$4 sm:$0xff]   ;;  %v5472_v30 = vld [vmem:[#allocation16 + $0xcc] ss:$16 sps:$4 sm:$0xff]  }
 0x258   :  { %v1736_v33 = vadd.f32 %v6293_v22, %v1695_v24  ;;  %v1699_v34 = vpop.f32.mrb[19].mxu1  ;;  %2721 = vmatprep.subr.bf16.mxu0 %v5421_v3  ;;  %2803 = vmatprep.subr.bf16.mxu1 %v5424_v20  ;;  %v6306_v22 = vsub.s32 2, %v6274_v49  ;;  %v5469_v19 = vld [vmem:[#allocation16 + $0xc4] ss:$16 sps:$4 sm:$0xff]   ;;  %v5467_v3 = vld [vmem:[#allocation16 + $0xc0] ss:$16 sps:$4 sm:$0xff]  }
 0x259   :  { %v1738_v36 = vadd.f32 %v6295_v25, %v1697_v27  ;;  %v5470_v20 = vld [vmem:[#allocation16 + $0xc8] ss:$16 sps:$4 sm:$0xff]   ;;  %v5478_v24 = vld [vmem:[#allocation16 + $0xec] ss:$16 sps:$4 sm:$0xff]   ;;  %v5473_v26 = vld [vmem:[#allocation16 + $0xe0] ss:$16 sps:$4 sm:$0xff]  }
 0x25a   :  { %v1837_v42 = vrot.slane %v6284_v59, %v6306_v22  ;;  %v5437_v59 = vld [vmem:[#allocation16 + $0x20] ss:$16 sps:$4 sm:$0xff]   ;;  %v5476_v27 = vld [vmem:[#allocation16 + $0xe8] ss:$16 sps:$4 sm:$0xff]   ;;  %v5481_v29 = vld [vmem:[#allocation16 + $0x104] ss:$16 sps:$4 sm:$0xff]  }
 0x25b   :  { %2722 = vmatpush1.bf16.msra.mxu0 %v5419_v31  ;;  %2804 = vmatpush1.bf16.msra.mxu1 %v5422_v63  ;;  %v5484_v31 = vld [vmem:[#allocation16 + $0x10c] ss:$16 sps:$4 sm:$0xff]   ;;  %v5479_v63 = vld [vmem:[#allocation16 + $0x100] ss:$16 sps:$4 sm:$0xff]   ;;  %v5487_v34 = vld [vmem:[#allocation16 + $0x124] ss:$16 sps:$4 sm:$0xff]  }
 0x25c   :  { %2723 = vmatprep.subr.bf16.mxu0 %v5427_v9  ;;  %2805 = vmatprep.subr.bf16.mxu1 %v5430_v35  ;;  %v5490_v9 = vld [vmem:[#allocation16 + $0x12c] ss:$16 sps:$4 sm:$0xff]   ;;  %v5485_v35 = vld [vmem:[#allocation16 + $0x120] ss:$16 sps:$4 sm:$0xff]  }
 0x25f   :  { %2724 = vmatpush1.bf16.msra.mxu0 %v5425_v28  ;;  %2806 = vmatpush1.bf16.msra.mxu1 %v5428_v38  ;;  %v5493_v28 = vld [vmem:[#allocation16 + $0x144] ss:$16 sps:$4 sm:$0xff]   ;;  %v5496_v38 = vld [vmem:[#allocation16 + $0x14c] ss:$16 sps:$4 sm:$0xff]  }
 0x260   :  { %3628 = vmatprep.subr.bf16.mxu0 %v5433_v32  ;;  %3710 = vmatprep.subr.bf16.mxu1 %v5436_v39  ;;  %v5491_v32 = vld [vmem:[#allocation16 + $0x140] ss:$16 sps:$4 sm:$0xff]   ;;  %v5494_v39 = vld [vmem:[#allocation16 + $0x148] ss:$16 sps:$4 sm:$0xff]  }
 0x295   :  { %v1776_v41 = vpop.f32.mrb[20].mxu1 }
 0x296   :  { %v1777_v25 = vadd.f32 %v1776_v41, %v1736_v33  ;;  %v1778_v43 = vpop.f32.mrb[21].mxu1  ;;  %v5482_v33 = vld [vmem:[#allocation16 + $0x108] ss:$16 sps:$4 sm:$0xff]   ;;  %v5499_v41 = vld [vmem:[#allocation16 + $0x164] ss:$16 sps:$4 sm:$0xff]  }
 0x297   :  { %v1779_v44 = vadd.f32 %v1778_v43, %v1738_v36  ;;  %v1780_v46 = vpop.f32.mrb[22].mxu1  ;;  %v5488_v36 = vld [vmem:[#allocation16 + $0x128] ss:$16 sps:$4 sm:$0xff]  }
 0x298   :  { %v1818_v0 = vadd.f32 %v6297_v21, %v1777_v25  ;;  %v1781_v47 = vpop.f32.mrb[23].mxu1  ;;  %v5440_v21 = vld [vmem:[#allocation16 + $0x28] ss:$16 sps:$4 sm:$0xff]   ;;  %v5502_v25 = vld [vmem:[#allocation16 + $0x16c] ss:$16 sps:$4 sm:$0xff]  }
 0x299   :  { %v1820_v48 = vadd.f32 %v6299_v37, %v1779_v44  ;;  %v5445_v37 = vld [vmem:[#allocation16 + $0x44] ss:$16 sps:$4 sm:$0xff]   ;;  %v5500_v43 = vld [vmem:[#allocation16 + $0x168] ss:$16 sps:$4 sm:$0xff]   ;;  %v5503_v46 = vld [vmem:[#allocation16 + $0x180] ss:$16 sps:$4 sm:$0xff]  }
 0x29a   :  { %v1848_v50 = vadd.f32 %v1837_v42, %v1818_v0  ;;  %v5497_v42 = vld [vmem:[#allocation16 + $0x160] ss:$16 sps:$4 sm:$0xff]   ;;  %v5505_v44 = vld [vmem:[#allocation16 + $0x184] ss:$16 sps:$4 sm:$0xff]   ;;  %v5506_v0 = vld [vmem:[#allocation16 + $0x188] ss:$16 sps:$4 sm:$0xff]  }
 0x29b   :  { %v1849_v51 = vadd.f32 %v1841_v45, %v1820_v48  ;;  %v5508_v45 = vld [vmem:[#allocation16 + $0x18c] ss:$16 sps:$4 sm:$0xff]   ;;  %v5511_v47 = vld [vmem:[#allocation16 + $0x1a4] ss:$16 sps:$4 sm:$0xff]  }
 0x29c   :  { %v1852_v49 = vmul.f32 0.2, %v1848_v50  ;;  %v5514_v48 = vld [vmem:[#allocation16 + $0x1ac] ss:$16 sps:$4 sm:$0xff]  }
 0x29d   :  { %v1853_v52 = vmul.f32 0.2, %v1849_v51 }
 0x29e   :  { %v1856_v53 = vmax.f32 %v1848_v50, %v1852_v49  ;;  %v5509_v50 = vld [vmem:[#allocation16 + $0x1a0] ss:$16 sps:$4 sm:$0xff]   ;;  %v5517_v49 = vld [vmem:[#allocation16 + $0x1c4] ss:$16 sps:$4 sm:$0xff]  }
 0x29f   :  { %v1857_v54 = vmax.f32 %v1849_v51, %v1853_v52  ;;  %v5512_v51 = vld [vmem:[#allocation16 + $0x1a8] ss:$16 sps:$4 sm:$0xff]   ;;  %v5520_v52 = vld [vmem:[#allocation16 + $0x1cc] ss:$16 sps:$4 sm:$0xff]  }
 0x2a0   :  { %v1860_v61 = vpack.c.bf16 %v1856_v53, %v1856_v53  ;;  %v5515_v53 = vld [vmem:[#allocation16 + $0x1c0] ss:$16 sps:$4 sm:$0xff]  }
 0x2a1   :  { %v1861_v55 = vpack.c.bf16 %v1857_v54, %v1857_v54  ;;  %v5518_v54 = vld [vmem:[#allocation16 + $0x1c8] ss:$16 sps:$4 sm:$0xff]  }
 0x2a3   :  { %2725 = vmatprep.mubr.bf16.mxu0 %v1861_v55  ;;  %2807 = vmatprep.mubr.bf16.mxu1 %v1861_v55  ;;  %v5523_v55 = vld [vmem:[#allocation16 + $0x1e4] ss:$16 sps:$4 sm:$0xff]  }
 0x2a4   :  { %2726 = vmatmul.mubr.bf16.vlgmr.msra.gmra.mrb[16].mxu0 %v1860_v61  ;;  %2808 = vmatmul.mubr.bf16.vlgmr.msra.gmra.mrb[24].mxu1 %v1860_v61  ;;  %v5524_v61 = vld [vmem:[#allocation16 + $0x1e8] ss:$16 sps:$4 sm:$0xff]  }
 0x2a5   :  { %3629 = vmatpush1.bf16.msra.mxu0 %v5431_v56  ;;  %3711 = vmatpush1.bf16.msra.mxu1 %v5434_v58  ;;  %v5526_v56 = vld [vmem:[#allocation16 + $0x1ec] ss:$16 sps:$4 sm:$0xff]   ;;  %v5521_v58 = vld [vmem:[#allocation16 + $0x1e0] ss:$16 sps:$4 sm:$0xff]  }
 0x2a6   :  { %3630 = vmatprep.subr.bf16.mxu0 %v5439_v62  ;;  %3712 = vmatprep.subr.bf16.mxu1 %v5442_v1  ;;  %v5529_v62 = vld [vmem:[#allocation16 + $0x204] ss:$16 sps:$4 sm:$0xff]   ;;  %v5532_v1 = vld [vmem:[#allocation16 + $0x20c] ss:$16 sps:$4 sm:$0xff]  }
 0x2a9   :  { %3631 = vmatpush1.bf16.msra.mxu0 %v5437_v59  ;;  %3713 = vmatpush1.bf16.msra.mxu1 %v5440_v21  ;;  %v6320_v59 = vld [vmem:[%s6395_s9] sm:$0xf]  ;;  %v2816_v21 = vld [vmem:[#allocation8] sm:$0xff] }
 0x2aa   :  { %3632 = vmatprep.subr.bf16.mxu0 %v5445_v37  ;;  %3714 = vmatprep.subr.bf16.mxu1 %v5448_v2  ;;  %v1995_v37 = vrot.slane %v6320_v59, %v6279_v57  ;;  %v6324_v2 = vld [vmem:[#allocation8 + $0x8] sm:$0xff] }
 0x2ad   :  { %3633 = vmatpush1.bf16.msra.mxu0 %v5443_v4  ;;  %3715 = vmatpush1.bf16.msra.mxu1 %v5446_v5  ;;  %v1999_v4 = vrot.slane %v6320_v59, %v6287_v60  ;;  %v2007_v5 = vrot.slane %v6320_v59, %v6309_v40 }
 0x2ae   :  { %3634 = vmatprep.subr.bf16.mxu0 %v5451_v6  ;;  %3716 = vmatprep.subr.bf16.mxu1 %v5454_v7  ;;  %v2818_v6 = vunpack.c.l.bf16 %v2816_v21 }
 0x2b1   :  { %3635 = vmatpush1.bf16.msra.mxu0 %v5449_v8  ;;  %3717 = vmatpush1.bf16.msra.mxu1 %v5452_v10  ;;  %v2819_v10 = vunpack.c.h.bf16 %v2816_v21  ;;  %v5569_v21 = vld [vmem:[#allocation16 + $0x2e0] ss:$16 sps:$4 sm:$0xff]  }
 0x2b2   :  { %3636 = vmatprep.subr.bf16.mxu0 %v5457_v11  ;;  %3718 = vmatprep.subr.bf16.mxu1 %v5460_v12  ;;  %v2821_v11 = vunpack.c.h.bf16 %v6324_v2 }
 0x2b5   :  { %3637 = vmatpush1.bf16.msra.mxu0 %v5455_v13  ;;  %3719 = vmatpush1.bf16.msra.mxu1 %v5458_v14 }
 0x2b6   :  { %3638 = vmatprep.subr.bf16.mxu0 %v5463_v15  ;;  %3720 = vmatprep.subr.bf16.mxu1 %v5466_v16 }
 0x2b9   :  { %3639 = vmatpush1.bf16.msra.mxu0 %v5461_v17  ;;  %3721 = vmatpush1.bf16.msra.mxu1 %v5464_v18 }
 0x2ba   :  { %3640 = vmatprep.subr.bf16.mxu0 %v5469_v19  ;;  %3722 = vmatprep.subr.bf16.mxu1 %v5472_v30 }
 0x2bd   :  { %3641 = vmatpush1.bf16.msra.mxu0 %v5467_v3  ;;  %3723 = vmatpush1.bf16.msra.mxu1 %v5470_v20 }
 0x2be   :  { %3642 = vmatprep.subr.bf16.mxu0 %v5475_v23  ;;  %3724 = vmatprep.subr.bf16.mxu1 %v5478_v24 }
 0x2c1   :  { %3643 = vmatpush1.bf16.msra.mxu0 %v5473_v26  ;;  %3725 = vmatpush1.bf16.msra.mxu1 %v5476_v27 }
 0x2c2   :  { %3644 = vmatprep.subr.bf16.mxu0 %v5481_v29  ;;  %3726 = vmatprep.subr.bf16.mxu1 %v5484_v31 }
 0x2c5   :  { %3645 = vmatpush1.bf16.msra.mxu0 %v5479_v63  ;;  %3727 = vmatpush1.bf16.msra.mxu1 %v5482_v33 }
 0x2c6   :  { %3646 = vmatprep.subr.bf16.mxu0 %v5487_v34  ;;  %3728 = vmatprep.subr.bf16.mxu1 %v5490_v9  ;;  %v5527_v34 = vld [vmem:[#allocation16 + $0x200] ss:$16 sps:$4 sm:$0xff]   ;;  %v5530_v9 = vld [vmem:[#allocation16 + $0x208] ss:$16 sps:$4 sm:$0xff]  }
 0x2c9   :  { %3647 = vmatpush1.bf16.msra.mxu0 %v5485_v35  ;;  %3729 = vmatpush1.bf16.msra.mxu1 %v5488_v36  ;;  %v5535_v36 = vld [vmem:[#allocation16 + $0x224] ss:$16 sps:$4 sm:$0xff]  }
 0x2ca   :  { %3648 = vmatprep.subr.bf16.mxu0 %v5493_v28  ;;  %3730 = vmatprep.subr.bf16.mxu1 %v5496_v38  ;;  %v5538_v28 = vld [vmem:[#allocation16 + $0x22c] ss:$16 sps:$4 sm:$0xff]  }
 0x2cd   :  { %3649 = vmatpush1.bf16.msra.mxu0 %v5491_v32  ;;  %3731 = vmatpush1.bf16.msra.mxu1 %v5494_v39  ;;  %v5533_v32 = vld [vmem:[#allocation16 + $0x220] ss:$16 sps:$4 sm:$0xff]   ;;  %v5536_v39 = vld [vmem:[#allocation16 + $0x228] ss:$16 sps:$4 sm:$0xff]  }
 0x2ce   :  { %3650 = vmatprep.subr.bf16.mxu0 %v5499_v41  ;;  %3732 = vmatprep.subr.bf16.mxu1 %v5502_v25  ;;  %v5541_v41 = vld [vmem:[#allocation16 + $0x244] ss:$16 sps:$4 sm:$0xff]   ;;  %v5544_v25 = vld [vmem:[#allocation16 + $0x24c] ss:$16 sps:$4 sm:$0xff]  }
 0x2d1   :  { %3651 = vmatpush1.bf16.msra.mxu0 %v5497_v42  ;;  %3733 = vmatpush1.bf16.msra.mxu1 %v5500_v43  ;;  %v5539_v42 = vld [vmem:[#allocation16 + $0x240] ss:$16 sps:$4 sm:$0xff]   ;;  %v5542_v43 = vld [vmem:[#allocation16 + $0x248] ss:$16 sps:$4 sm:$0xff]  }
 0x2d2   :  { %3652 = vmatprep.subr.bf16.mxu0 %v5505_v44  ;;  %3734 = vmatprep.subr.bf16.mxu1 %v5508_v45  ;;  %v5547_v44 = vld [vmem:[#allocation16 + $0x264] ss:$16 sps:$4 sm:$0xff]   ;;  %v5550_v45 = vld [vmem:[#allocation16 + $0x26c] ss:$16 sps:$4 sm:$0xff]  }
 0x2d5   :  { %3653 = vmatpush1.bf16.msra.mxu0 %v5503_v46  ;;  %3735 = vmatpush1.bf16.msra.mxu1 %v5506_v0  ;;  %v5545_v46 = vld [vmem:[#allocation16 + $0x260] ss:$16 sps:$4 sm:$0xff]   ;;  %v5548_v0 = vld [vmem:[#allocation16 + $0x268] ss:$16 sps:$4 sm:$0xff]  }
 0x2d6   :  { %3654 = vmatprep.subr.bf16.mxu0 %v5511_v47  ;;  %3736 = vmatprep.subr.bf16.mxu1 %v5514_v48  ;;  %v5553_v47 = vld [vmem:[#allocation16 + $0x284] ss:$16 sps:$4 sm:$0xff]   ;;  %v5556_v48 = vld [vmem:[#allocation16 + $0x28c] ss:$16 sps:$4 sm:$0xff]  }
 0x2d9   :  { %3655 = vmatpush1.bf16.msra.mxu0 %v5509_v50  ;;  %3737 = vmatpush1.bf16.msra.mxu1 %v5512_v51  ;;  %v5551_v50 = vld [vmem:[#allocation16 + $0x280] ss:$16 sps:$4 sm:$0xff]   ;;  %v5554_v51 = vld [vmem:[#allocation16 + $0x288] ss:$16 sps:$4 sm:$0xff]  }
 0x2da   :  { %3656 = vmatprep.subr.bf16.mxu0 %v5517_v49  ;;  %3738 = vmatprep.subr.bf16.mxu1 %v5520_v52  ;;  %v5559_v49 = vld [vmem:[#allocation16 + $0x2a4] ss:$16 sps:$4 sm:$0xff]   ;;  %v5562_v52 = vld [vmem:[#allocation16 + $0x2ac] ss:$16 sps:$4 sm:$0xff]  }
 0x2dd   :  { %3657 = vmatpush1.bf16.msra.mxu0 %v5515_v53  ;;  %3739 = vmatpush1.bf16.msra.mxu1 %v5518_v54  ;;  %v5557_v53 = vld [vmem:[#allocation16 + $0x2a0] ss:$16 sps:$4 sm:$0xff]   ;;  %v5560_v54 = vld [vmem:[#allocation16 + $0x2a8] ss:$16 sps:$4 sm:$0xff]  }
 0x2de   :  { %3658 = vmatprep.subr.bf16.mxu0 %v5523_v55  ;;  %3740 = vmatprep.subr.bf16.mxu1 %v5526_v56  ;;  %v5565_v55 = vld [vmem:[#allocation16 + $0x2c4] ss:$16 sps:$4 sm:$0xff]   ;;  %v5568_v56 = vld [vmem:[#allocation16 + $0x2cc] ss:$16 sps:$4 sm:$0xff]  }
 0x2e1   :  { %3659 = vmatpush1.bf16.msra.mxu0 %v5521_v58  ;;  %3741 = vmatpush1.bf16.msra.mxu1 %v5524_v61  ;;  %v5563_v58 = vld [vmem:[#allocation16 + $0x2c0] ss:$16 sps:$4 sm:$0xff]   ;;  %v5566_v61 = vld [vmem:[#allocation16 + $0x2c8] ss:$16 sps:$4 sm:$0xff]  }
 0x2e2   :  { %3669 = vmatprep.subr.bf16.mxu0 %v5529_v62  ;;  %3751 = vmatprep.subr.bf16.mxu1 %v5532_v1  ;;  %v5571_v62 = vld [vmem:[#allocation16 + $0x2e4] ss:$16 sps:$4 sm:$0xff]   ;;  %v5574_v1 = vld [vmem:[#allocation16 + $0x2ec] ss:$16 sps:$4 sm:$0xff]  }
 0x377   :  { %v2727_v7 = vpop.f32.mrb[16].mxu0  ;;  %v6330_v8 = vpop.f32.mrb[24].mxu1 }
 0x378   :  { %v4885_v12 = vadd.f32 %v2727_v7, %v1995_v37  ;;  %v2729_v13 = vpop.f32.mrb[17].mxu0  ;;  %v2811_v14 = vpop.f32.mrb[25].mxu1  ;;  %v5572_v37 = vld [vmem:[#allocation16 + $0x2e8] ss:$16 sps:$4 sm:$0xff]  }
 0x379   :  { %v4886_v15 = vadd.f32 %v2729_v13, %v1999_v4  ;;  %v4888_v16 = vadd.f32 %v2811_v14, %v2007_v5  ;;  %v2731_v17 = vpop.f32.mrb[18].mxu0  ;;  %v2813_v18 = vpop.f32.mrb[26].mxu1  ;;  %v5577_v4 = vld [vmem:[#allocation16 + $0x304] ss:$16 sps:$4 sm:$0xff]   ;;  %v5580_v5 = vld [vmem:[#allocation16 + $0x30c] ss:$16 sps:$4 sm:$0xff]  }
 0x37a   :  { %v2822_v19 = vmul.f32 %v4885_v12, %v2818_v6  ;;  %v2732_v30 = vpop.f32.mrb[19].mxu0  ;;  %v2814_v3 = vpop.f32.mrb[27].mxu1  ;;  %v5575_v6 = vld [vmem:[#allocation16 + $0x300] ss:$16 sps:$4 sm:$0xff]   ;;  %v5578_v7 = vld [vmem:[#allocation16 + $0x308] ss:$16 sps:$4 sm:$0xff]  }
 0x37b   :  { %v2823_v20 = vmul.f32 %v4886_v15, %v2819_v10  ;;  %v2825_v23 = vmul.f32 %v4888_v16, %v2821_v11  ;;  %v5583_v10 = vld [vmem:[#allocation16 + $0x324] ss:$16 sps:$4 sm:$0xff]   ;;  %v5586_v11 = vld [vmem:[#allocation16 + $0x32c] ss:$16 sps:$4 sm:$0xff]   ;;  %v5581_v12 = vld [vmem:[#allocation16 + $0x320] ss:$16 sps:$4 sm:$0xff]  }
 0x37c   :  { %v2826_v24 = vmul.f32 0.2, %v2822_v19  ;;  %v5584_v13 = vld [vmem:[#allocation16 + $0x328] ss:$16 sps:$4 sm:$0xff]   ;;  %v5589_v14 = vld [vmem:[#allocation16 + $0x344] ss:$16 sps:$4 sm:$0xff]  }
 0x37d   :  { %v2827_v26 = vmul.f32 0.2, %v2823_v20  ;;  %v2829_v27 = vmul.f32 0.2, %v2825_v23  ;;  %v5592_v15 = vld [vmem:[#allocation16 + $0x34c] ss:$16 sps:$4 sm:$0xff]  }
 0x37e   :  { %v2830_v29 = vmax.f32 %v2822_v19, %v2826_v24  ;;  %v5587_v16 = vld [vmem:[#allocation16 + $0x340] ss:$16 sps:$4 sm:$0xff]   ;;  %v5590_v17 = vld [vmem:[#allocation16 + $0x348] ss:$16 sps:$4 sm:$0xff]   ;;  %v5595_v18 = vld [vmem:[#allocation16 + $0x364] ss:$16 sps:$4 sm:$0xff]  }
 0x37f   :  { %v2831_v31 = vmax.f32 %v2823_v20, %v2827_v26  ;;  %v2833_v63 = vmax.f32 %v2825_v23, %v2829_v27  ;;  %v5598_v19 = vld [vmem:[#allocation16 + $0x36c] ss:$16 sps:$4 sm:$0xff]   ;;  %v5593_v30 = vld [vmem:[#allocation16 + $0x360] ss:$16 sps:$4 sm:$0xff]   ;;  %v5596_v3 = vld [vmem:[#allocation16 + $0x368] ss:$16 sps:$4 sm:$0xff]   ;;  %v2003_v20 = vrot.slane %v6320_v59, %v6306_v22 }
 0x380   :  { %v2834_v35 = vpack.c.bf16 %v2830_v29, %v2830_v29  ;;  %v5601_v23 = vld [vmem:[#allocation16 + $0x384] ss:$16 sps:$4 sm:$0xff]   ;;  %v5604_v24 = vld [vmem:[#allocation16 + $0x38c] ss:$16 sps:$4 sm:$0xff]   ;;  %v5599_v26 = vld [vmem:[#allocation16 + $0x380] ss:$16 sps:$4 sm:$0xff]  }
 0x381   :  { %v2835_v33 = vpack.c.bf16 %v2831_v31, %v2831_v31  ;;  %v2837_v38 = vpack.c.bf16 %v2833_v63, %v2833_v63  ;;  %v5602_v27 = vld [vmem:[#allocation16 + $0x388] ss:$16 sps:$4 sm:$0xff]   ;;  %v4887_v29 = vadd.f32 %v6330_v8, %v2003_v20  ;;  %v2820_v31 = vunpack.c.l.bf16 %v6324_v2  ;;  %v5607_v63 = vld [vmem:[#allocation16 + $0x3a4] ss:$16 sps:$4 sm:$0xff]  }
 0x382   :  { %v5608_v59 = vld [vmem:[#allocation16 + $0x3a8] ss:$16 sps:$4 sm:$0xff]   ;;  %v5619_v2 = vld [vmem:[#allocation16 + $0x3e4] ss:$16 sps:$4 sm:$0xff]  }
 0x383   :  { %3660 = vmatprep.mubr.bf16.mxu0 %v2835_v33  ;;  %3742 = vmatprep.mubr.bf16.mxu1 %v2835_v33  ;;  %v5610_v33 = vld [vmem:[#allocation16 + $0x3ac] ss:$16 sps:$4 sm:$0xff]  }
 0x384   :  { %3661 = vmatmul.mubr.bf16.vlgmr.msra.gmra.mrb[20].mxu0 %v2834_v35  ;;  %3743 = vmatmul.mubr.bf16.vlgmr.msra.gmra.mrb[28].mxu1 %v2834_v35  ;;  %v5613_v35 = vld [vmem:[#allocation16 + $0x3c4] ss:$16 sps:$4 sm:$0xff]  }
 0x385   :  { %3670 = vmatpush1.bf16.msra.mxu0 %v5527_v34  ;;  %3752 = vmatpush1.bf16.msra.mxu1 %v5530_v9  ;;  %v5605_v34 = vld [vmem:[#allocation16 + $0x3a0] ss:$16 sps:$4 sm:$0xff]   ;;  %v2824_v9 = vmul.f32 %v4887_v29, %v2820_v31 }
 0x386   :  { %3701 = vmatprep.mubr.bf16.mxu0 %v2837_v38  ;;  %3783 = vmatprep.mubr.bf16.mxu1 %v2837_v38  ;;  %v5614_v38 = vld [vmem:[#allocation16 + $0x3c8] ss:$16 sps:$4 sm:$0xff]  }
 0x387   :  { %3671 = vmatprep.subr.bf16.mxu0 %v5535_v36  ;;  %3753 = vmatprep.subr.bf16.mxu1 %v5538_v28  ;;  %v5616_v36 = vld [vmem:[#allocation16 + $0x3cc] ss:$16 sps:$4 sm:$0xff]   ;;  %v5611_v28 = vld [vmem:[#allocation16 + $0x3c0] ss:$16 sps:$4 sm:$0xff]   ;;  %v2828_v8 = vmul.f32 0.2, %v2824_v9 }
 0x389   :  { %3672 = vmatpush1.bf16.msra.mxu0 %v5533_v32  ;;  %3754 = vmatpush1.bf16.msra.mxu1 %v5536_v39  ;;  %v5622_v32 = vld [vmem:[#allocation16 + $0x3ec] ss:$16 sps:$4 sm:$0xff]   ;;  %v5617_v39 = vld [vmem:[#allocation16 + $0x3e0] ss:$16 sps:$4 sm:$0xff]  }
 0x38a   :  { %3673 = vmatprep.subr.bf16.mxu0 %v5541_v41  ;;  %3755 = vmatprep.subr.bf16.mxu1 %v5544_v25  ;;  %v5620_v41 = vld [vmem:[#allocation16 + $0x3e8] ss:$16 sps:$4 sm:$0xff]   ;;  %v2832_v25 = vmax.f32 %v2824_v9, %v2828_v8 }
 0x38d   :  { %3674 = vmatpush1.bf16.msra.mxu0 %v5539_v42  ;;  %3756 = vmatpush1.bf16.msra.mxu1 %v5542_v43  ;;  %v5625_v42 = vld [vmem:[#allocation17 + $0x4] ss:$8 sps:$4 sm:$0xff]   ;;  %v5623_v43 = vld [vmem:[#allocation17] ss:$8 sps:$4 sm:$0xff]  }
 0x38e   :  { %3675 = vmatprep.subr.bf16.mxu0 %v5547_v44  ;;  %3757 = vmatprep.subr.bf16.mxu1 %v5550_v45  ;;  %v2836_v44 = vpack.c.bf16 %v2832_v25, %v2832_v25  ;;  %v5628_v45 = vld [vmem:[#allocation17 + $0x14] ss:$8 sps:$4 sm:$0xff]  }
 0x391   :  { %3676 = vmatpush1.bf16.msra.mxu0 %v5545_v46  ;;  %3758 = vmatpush1.bf16.msra.mxu1 %v5548_v0  ;;  %v5626_v46 = vld [vmem:[#allocation17 + $0x10] ss:$8 sps:$4 sm:$0xff]   ;;  %v5631_v0 = vld [vmem:[#allocation17 + $0x24] ss:$8 sps:$4 sm:$0xff]  }
 0x392   :  { %3677 = vmatprep.subr.bf16.mxu0 %v5553_v47  ;;  %3759 = vmatprep.subr.bf16.mxu1 %v5556_v48  ;;  %v5629_v47 = vld [vmem:[#allocation17 + $0x20] ss:$8 sps:$4 sm:$0xff]   ;;  %v5634_v48 = vld [vmem:[#allocation17 + $0x34] ss:$8 sps:$4 sm:$0xff]  }
 0x395   :  { %3678 = vmatpush1.bf16.msra.mxu0 %v5551_v50  ;;  %3760 = vmatpush1.bf16.msra.mxu1 %v5554_v51  ;;  %v5632_v50 = vld [vmem:[#allocation17 + $0x30] ss:$8 sps:$4 sm:$0xff]   ;;  %v5637_v51 = vld [vmem:[#allocation17 + $0x44] ss:$8 sps:$4 sm:$0xff]  }
 0x396   :  { %3679 = vmatprep.subr.bf16.mxu0 %v5559_v49  ;;  %3761 = vmatprep.subr.bf16.mxu1 %v5562_v52  ;;  %v5635_v49 = vld [vmem:[#allocation17 + $0x40] ss:$8 sps:$4 sm:$0xff]   ;;  %v5640_v52 = vld [vmem:[#allocation17 + $0x54] ss:$8 sps:$4 sm:$0xff]  }
 0x399   :  { %3680 = vmatpush1.bf16.msra.mxu0 %v5557_v53  ;;  %3762 = vmatpush1.bf16.msra.mxu1 %v5560_v54  ;;  %v5638_v53 = vld [vmem:[#allocation17 + $0x50] ss:$8 sps:$4 sm:$0xff]   ;;  %v5643_v54 = vld [vmem:[#allocation17 + $0x64] ss:$8 sps:$4 sm:$0xff]  }
 0x39a   :  { %3681 = vmatprep.subr.bf16.mxu0 %v5565_v55  ;;  %3763 = vmatprep.subr.bf16.mxu1 %v5568_v56  ;;  %v5641_v55 = vld [vmem:[#allocation17 + $0x60] ss:$8 sps:$4 sm:$0xff]   ;;  %v5646_v56 = vld [vmem:[#allocation17 + $0x74] ss:$8 sps:$4 sm:$0xff]  }
 0x39d   :  { %3682 = vmatpush1.bf16.msra.mxu0 %v5563_v58  ;;  %3764 = vmatpush1.bf16.msra.mxu1 %v5566_v61  ;;  %v5644_v58 = vld [vmem:[#allocation17 + $0x70] ss:$8 sps:$4 sm:$0xff]   ;;  %v5649_v61 = vld [vmem:[#allocation17 + $0x84] ss:$8 sps:$4 sm:$0xff]  }
 0x39e   :  { %3683 = vmatprep.subr.bf16.mxu0 %v5571_v62  ;;  %3765 = vmatprep.subr.bf16.mxu1 %v5574_v1  ;;  %v5647_v62 = vld [vmem:[#allocation17 + $0x80] ss:$8 sps:$4 sm:$0xff]   ;;  %v5652_v1 = vld [vmem:[#allocation17 + $0x94] ss:$8 sps:$4 sm:$0xff]  }
 0x3a1   :  { %3684 = vmatpush1.bf16.msra.mxu0 %v5569_v21  ;;  %3766 = vmatpush1.bf16.msra.mxu1 %v5572_v37  ;;  %v5650_v21 = vld [vmem:[#allocation17 + $0x90] ss:$8 sps:$4 sm:$0xff]   ;;  %v5655_v37 = vld [vmem:[#allocation17 + $0xa4] ss:$8 sps:$4 sm:$0xff]  }
 0x3a2   :  { %3685 = vmatprep.subr.bf16.mxu0 %v5577_v4  ;;  %3767 = vmatprep.subr.bf16.mxu1 %v5580_v5  ;;  %v5653_v4 = vld [vmem:[#allocation17 + $0xa0] ss:$8 sps:$4 sm:$0xff]   ;;  %v5658_v5 = vld [vmem:[#allocation17 + $0xb4] ss:$8 sps:$4 sm:$0xff]  }
 0x3a5   :  { %3686 = vmatpush1.bf16.msra.mxu0 %v5575_v6  ;;  %3768 = vmatpush1.bf16.msra.mxu1 %v5578_v7  ;;  %v5656_v6 = vld [vmem:[#allocation17 + $0xb0] ss:$8 sps:$4 sm:$0xff]   ;;  %v5661_v7 = vld [vmem:[#allocation17 + $0xc4] ss:$8 sps:$4 sm:$0xff]  }
 0x3a6   :  { %3687 = vmatprep.subr.bf16.mxu0 %v5583_v10  ;;  %3769 = vmatprep.subr.bf16.mxu1 %v5586_v11  ;;  %v5659_v10 = vld [vmem:[#allocation17 + $0xc0] ss:$8 sps:$4 sm:$0xff]   ;;  %v5664_v11 = vld [vmem:[#allocation17 + $0xd4] ss:$8 sps:$4 sm:$0xff]  }
 0x3a9   :  { %3688 = vmatpush1.bf16.msra.mxu0 %v5581_v12  ;;  %3770 = vmatpush1.bf16.msra.mxu1 %v5584_v13  ;;  %v5662_v12 = vld [vmem:[#allocation17 + $0xd0] ss:$8 sps:$4 sm:$0xff]   ;;  %v5667_v13 = vld [vmem:[#allocation17 + $0xe4] ss:$8 sps:$4 sm:$0xff]  }
 0x3aa   :  { %3689 = vmatprep.subr.bf16.mxu0 %v5589_v14  ;;  %3771 = vmatprep.subr.bf16.mxu1 %v5592_v15  ;;  %v5665_v14 = vld [vmem:[#allocation17 + $0xe0] ss:$8 sps:$4 sm:$0xff]   ;;  %v5670_v15 = vld [vmem:[#allocation17 + $0xf4] ss:$8 sps:$4 sm:$0xff]  }
 0x3ad   :  { %3690 = vmatpush1.bf16.msra.mxu0 %v5587_v16  ;;  %3772 = vmatpush1.bf16.msra.mxu1 %v5590_v17  ;;  %v5668_v16 = vld [vmem:[#allocation17 + $0xf0] ss:$8 sps:$4 sm:$0xff]   ;;  %v5673_v17 = vld [vmem:[#allocation17 + $0x104] ss:$8 sps:$4 sm:$0xff]  }
 0x3ae   :  { %3691 = vmatprep.subr.bf16.mxu0 %v5595_v18  ;;  %3773 = vmatprep.subr.bf16.mxu1 %v5598_v19  ;;  %v6340_v18 = vld [vmem:[%s6397_s11] sm:$0xf]  ;;  %v3792_v19 = vld [vmem:[#allocation10] sm:$0xff] }
 0x3af   :  { %v2975_v20 = vrot.slane %v6340_v18, %v6287_v60  ;;  %v3795_v29 = vunpack.c.h.bf16 %v3792_v19 }
 0x3b1   :  { %3692 = vmatpush1.bf16.msra.mxu0 %v5593_v30  ;;  %3774 = vmatpush1.bf16.msra.mxu1 %v5596_v3  ;;  %v2971_v30 = vrot.slane %v6340_v18, %v6279_v57  ;;  %v6344_v3 = vld [vmem:[#allocation10 + $0x8] sm:$0xff] }
 0x3b2   :  { %3693 = vmatprep.subr.bf16.mxu0 %v5601_v23  ;;  %3775 = vmatprep.subr.bf16.mxu1 %v5604_v24  ;;  %v2983_v23 = vrot.slane %v6340_v18, %v6309_v40  ;;  %v3794_v24 = vunpack.c.l.bf16 %v3792_v19  ;;  %v3797_v31 = vunpack.c.h.bf16 %v6344_v3  ;;  %v5710_v19 = vld [vmem:[#allocation17 + $0x1d0] ss:$8 sps:$4 sm:$0xff]  }
 0x3b5   :  { %3694 = vmatpush1.bf16.msra.mxu0 %v5599_v26  ;;  %3776 = vmatpush1.bf16.msra.mxu1 %v5602_v27 }
 0x3b6   :  { %3695 = vmatprep.subr.bf16.mxu0 %v5607_v63  ;;  %3777 = vmatprep.subr.bf16.mxu1 %v5610_v33 }
 0x3b9   :  { %3696 = vmatpush1.bf16.msra.mxu0 %v5605_v34  ;;  %3778 = vmatpush1.bf16.msra.mxu1 %v5608_v59 }
 0x3ba   :  { %3697 = vmatprep.subr.bf16.mxu0 %v5613_v35  ;;  %3779 = vmatprep.subr.bf16.mxu1 %v5616_v36 }
 0x3bd   :  { %3698 = vmatpush1.bf16.msra.mxu0 %v5611_v28  ;;  %3780 = vmatpush1.bf16.msra.mxu1 %v5614_v38 }
 0x3be   :  { %3699 = vmatprep.subr.bf16.mxu0 %v5619_v2  ;;  %3781 = vmatprep.subr.bf16.mxu1 %v5622_v32 }
 0x3c1   :  { %3700 = vmatpush1.bf16.msra.mxu0 %v5617_v39  ;;  %3782 = vmatpush1.bf16.msra.mxu1 %v5620_v41 }
 0x3c2   :  { %4210 = vmatprep.subr.bf16.mxu0 %v5625_v42 }
 0x3c4   :  { %3702 = vmatmul.mubr.bf16.vlgmr.msra.gmra.mrb[20].mxu0 %v2836_v44  ;;  %3784 = vmatmul.mubr.bf16.vlgmr.msra.gmra.mrb[28].mxu1 %v2836_v44 }
 0x3c5   :  { %4211 = vmatpush1.bf16.msra.mxu0 %v5623_v43 }
 0x3c6   :  { %4212 = vmatprep.subr.bf16.mxu0 %v5628_v45  ;;  %v5671_v45 = vld [vmem:[#allocation17 + $0x100] ss:$8 sps:$4 sm:$0xff]  }
 0x3c9   :  { %4213 = vmatpush1.bf16.msra.mxu0 %v5626_v46 }
 0x3ca   :  { %4214 = vmatprep.subr.bf16.mxu0 %v5631_v0  ;;  %v5676_v0 = vld [vmem:[#allocation17 + $0x114] ss:$8 sps:$4 sm:$0xff]  }
 0x3cd   :  { %4215 = vmatpush1.bf16.msra.mxu0 %v5629_v47 }
 0x3ce   :  { %4216 = vmatprep.subr.bf16.mxu0 %v5634_v48  ;;  %v5674_v48 = vld [vmem:[#allocation17 + $0x110] ss:$8 sps:$4 sm:$0xff]  }
 0x3d1   :  { %4217 = vmatpush1.bf16.msra.mxu0 %v5632_v50  ;;  %v5679_v50 = vld [vmem:[#allocation17 + $0x124] ss:$8 sps:$4 sm:$0xff]  }
 0x3d2   :  { %4218 = vmatprep.subr.bf16.mxu0 %v5637_v51  ;;  %v5677_v51 = vld [vmem:[#allocation17 + $0x120] ss:$8 sps:$4 sm:$0xff]  }
 0x3d5   :  { %4219 = vmatpush1.bf16.msra.mxu0 %v5635_v49  ;;  %v5682_v49 = vld [vmem:[#allocation17 + $0x134] ss:$8 sps:$4 sm:$0xff]  }
 0x3d6   :  { %4220 = vmatprep.subr.bf16.mxu0 %v5640_v52  ;;  %v5680_v52 = vld [vmem:[#allocation17 + $0x130] ss:$8 sps:$4 sm:$0xff]  }
 0x3d9   :  { %4221 = vmatpush1.bf16.msra.mxu0 %v5638_v53  ;;  %v5685_v53 = vld [vmem:[#allocation17 + $0x144] ss:$8 sps:$4 sm:$0xff]  }
 0x3da   :  { %4222 = vmatprep.subr.bf16.mxu0 %v5643_v54  ;;  %v5683_v54 = vld [vmem:[#allocation17 + $0x140] ss:$8 sps:$4 sm:$0xff]  }
 0x3dd   :  { %4223 = vmatpush1.bf16.msra.mxu0 %v5641_v55  ;;  %v5688_v55 = vld [vmem:[#allocation17 + $0x154] ss:$8 sps:$4 sm:$0xff]  }
 0x3de   :  { %4224 = vmatprep.subr.bf16.mxu0 %v5646_v56  ;;  %v5686_v56 = vld [vmem:[#allocation17 + $0x150] ss:$8 sps:$4 sm:$0xff]  }
 0x3e1   :  { %4225 = vmatpush1.bf16.msra.mxu0 %v5644_v58  ;;  %v5691_v58 = vld [vmem:[#allocation17 + $0x164] ss:$8 sps:$4 sm:$0xff]  }
 0x3e2   :  { %4226 = vmatprep.subr.bf16.mxu0 %v5649_v61  ;;  %v5689_v61 = vld [vmem:[#allocation17 + $0x160] ss:$8 sps:$4 sm:$0xff]  }
 0x3e5   :  { %4227 = vmatpush1.bf16.msra.mxu0 %v5647_v62  ;;  %v5694_v62 = vld [vmem:[#allocation17 + $0x174] ss:$8 sps:$4 sm:$0xff]  }
 0x3e6   :  { %4228 = vmatprep.subr.bf16.mxu0 %v5652_v1  ;;  %v5692_v1 = vld [vmem:[#allocation17 + $0x170] ss:$8 sps:$4 sm:$0xff]  }
 0x3e9   :  { %4229 = vmatpush1.bf16.msra.mxu0 %v5650_v21  ;;  %v5697_v21 = vld [vmem:[#allocation17 + $0x184] ss:$8 sps:$4 sm:$0xff]  }
 0x3ea   :  { %4230 = vmatprep.subr.bf16.mxu0 %v5655_v37  ;;  %v5695_v37 = vld [vmem:[#allocation17 + $0x180] ss:$8 sps:$4 sm:$0xff]  }
 0x3ed   :  { %4231 = vmatpush1.bf16.msra.mxu0 %v5653_v4  ;;  %v5700_v4 = vld [vmem:[#allocation17 + $0x194] ss:$8 sps:$4 sm:$0xff]  }
 0x3ee   :  { %4232 = vmatprep.subr.bf16.mxu0 %v5658_v5  ;;  %v5698_v5 = vld [vmem:[#allocation17 + $0x190] ss:$8 sps:$4 sm:$0xff]  }
 0x3f1   :  { %4233 = vmatpush1.bf16.msra.mxu0 %v5656_v6  ;;  %v5703_v6 = vld [vmem:[#allocation17 + $0x1a4] ss:$8 sps:$4 sm:$0xff]  }
 0x3f2   :  { %4234 = vmatprep.subr.bf16.mxu0 %v5661_v7  ;;  %v5701_v7 = vld [vmem:[#allocation17 + $0x1a0] ss:$8 sps:$4 sm:$0xff]  }
 0x3f5   :  { %4235 = vmatpush1.bf16.msra.mxu0 %v5659_v10  ;;  %v5706_v10 = vld [vmem:[#allocation17 + $0x1b4] ss:$8 sps:$4 sm:$0xff]  }
 0x3f6   :  { %4236 = vmatprep.subr.bf16.mxu0 %v5664_v11  ;;  %v5704_v11 = vld [vmem:[#allocation17 + $0x1b0] ss:$8 sps:$4 sm:$0xff]  }
 0x3f9   :  { %4237 = vmatpush1.bf16.msra.mxu0 %v5662_v12  ;;  %v2979_v12 = vrot.slane %v6340_v18, %v6306_v22  ;;  %v5718_v22 = vld [vmem:[#allocation17 + $0x1f4] ss:$8 sps:$4 sm:$0xff]   ;;  %v5716_v18 = vld [vmem:[#allocation17 + $0x1f0] ss:$8 sps:$4 sm:$0xff]  }
 0x3fa   :  { %4238 = vmatprep.subr.bf16.mxu0 %v5667_v13  ;;  %v5709_v13 = vld [vmem:[#allocation17 + $0x1c4] ss:$8 sps:$4 sm:$0xff]  }
 0x3fd   :  { %4239 = vmatpush1.bf16.msra.mxu0 %v5665_v14  ;;  %v5707_v14 = vld [vmem:[#allocation17 + $0x1c0] ss:$8 sps:$4 sm:$0xff]  }
 0x3fe   :  { %4240 = vmatprep.subr.bf16.mxu0 %v5670_v15 }
 0x401   :  { %4241 = vmatpush1.bf16.msra.mxu0 %v5668_v16  ;;  %v3796_v16 = vunpack.c.l.bf16 %v6344_v3  ;;  %v3878_v3 = vld [vmem:[%s6399_s13] sm:$0x3]  ;;  %s4326_s13 = sshll.u32 %s6016_s2, 4  ;;  %s4327_s13 = int_to_ptr.vmem [resolvable:$true] %s4326_s13 }
 0x402   :  { %4251 = vmatprep.subr.bf16.mxu0 %v5673_v17  ;;  %v5712_v17 = vld [vmem:[#allocation17 + $0x1d4] ss:$8 sps:$4 sm:$0xff]   ;;  %s5941_s20 = scalar_lea.vmem %s4327_s13, 128  ;;  %p5946_p11 = scmp.lt.s32.totalorder %s4327_s13, %s4327_s13 }
 0x403   :  { %p5942_p10 = scmp.ne.s32.totalorder %s4327_s13, %s5941_s20  ;;  %p5947_p12 = scmp.lt.s32.totalorder %s5941_s20, %s5941_s20 }
 0x405   :  { %p5948_p13 = por %p5947_p12, %p5946_p11 }
 0x407   :  { %p5949_p0 = pnand %p5948_p13, %p5942_p10 }
 0x497   :  { %v3703_v26 = vpop.f32.mrb[20].mxu0  ;;  %v6350_v27 = vpop.f32.mrb[28].mxu1 }
 0x498   :  { %v4889_v63 = vadd.f32 %v3703_v26, %v2971_v30  ;;  %v3705_v33 = vpop.f32.mrb[21].mxu0  ;;  %v3787_v34 = vpop.f32.mrb[29].mxu1  ;;  %v4891_v15 = vadd.f32 %v6350_v27, %v2979_v12 }
 0x499   :  { %v4890_v59 = vadd.f32 %v3705_v33, %v2975_v20  ;;  %v4892_v9 = vadd.f32 %v3787_v34, %v2983_v23  ;;  %v3707_v35 = vpop.f32.mrb[22].mxu0  ;;  %v3789_v36 = vpop.f32.mrb[30].mxu1  ;;  %v5715_v20 = vld [vmem:[#allocation17 + $0x1e4] ss:$8 sps:$4 sm:$0xff]   ;;  %v5713_v23 = vld [vmem:[#allocation17 + $0x1e0] ss:$8 sps:$4 sm:$0xff]  }
 0x49a   :  { %v3798_v28 = vmul.f32 %v4889_v63, %v3794_v24  ;;  %v3708_v38 = vpop.f32.mrb[23].mxu0  ;;  %v3790_v8 = vpop.f32.mrb[31].mxu1  ;;  %v3800_v30 = vmul.f32 %v4891_v15, %v3796_v16 }
 0x49b   :  { %v3799_v2 = vmul.f32 %v4890_v59, %v3795_v29  ;;  %v3801_v32 = vmul.f32 %v4892_v9, %v3797_v31  ;;  %v3883_v29 = vrot.slane %v3878_v3, %v6279_v57  ;;  %v3887_v31 = vrot.slane %v3878_v3, %v6287_v60 }
 0x49c   :  { %v3802_v40 = vmul.f32 0.2, %v3798_v28  ;;  %v3804_v24 = vmul.f32 0.2, %v3800_v30 }
 0x49d   :  { %v3803_v39 = vmul.f32 0.2, %v3799_v2  ;;  %v3805_v41 = vmul.f32 0.2, %v3801_v32 }
 0x49e   :  { %v3806_v25 = vmax.f32 %v3798_v28, %v3802_v40  ;;  %v3808_v26 = vmax.f32 %v3800_v30, %v3804_v24 }
 0x49f   :  { %v3807_v42 = vmax.f32 %v3799_v2, %v3803_v39  ;;  %v3809_v43 = vmax.f32 %v3801_v32, %v3805_v41  ;;  %v4295_v32 = vld [vmem:[#allocation7] sm:$0xff] }
 0x4a0   :  { %v3810_v46 = vpack.c.bf16 %v3806_v25, %v3806_v25  ;;  %v3812_v27 = vpack.c.bf16 %v3808_v26, %v3808_v26 }
 0x4a1   :  { %v3811_v44 = vpack.c.bf16 %v3807_v42, %v3807_v42  ;;  %v3813_v47 = vpack.c.bf16 %v3809_v43, %v3809_v43 }
 0x4a3   :  { %4242 = vmatprep.mubr.bf16.mxu0 %v3811_v44 }
 0x4a4   :  { %4243 = vmatmul.mubr.bf16.vlgmr.msra.gmra.mrb[24].mxu0 %v3810_v46 }
 0x4a5   :  { %4252 = vmatpush1.bf16.msra.mxu0 %v5671_v45  ;;  %4283 = vmatprep.mubr.bf16.mxu0 %v3813_v47 }
 0x4a6   :  { %4253 = vmatprep.subr.bf16.mxu0 %v5676_v0 }
 0x4a9   :  { %4254 = vmatpush1.bf16.msra.mxu0 %v5674_v48 }
 0x4aa   :  { %4255 = vmatprep.subr.bf16.mxu0 %v5679_v50 }
 0x4ad   :  { %4256 = vmatpush1.bf16.msra.mxu0 %v5677_v51 }
 0x4ae   :  { %4257 = vmatprep.subr.bf16.mxu0 %v5682_v49 }
 0x4b1   :  { %4258 = vmatpush1.bf16.msra.mxu0 %v5680_v52 }
 0x4b2   :  { %4259 = vmatprep.subr.bf16.mxu0 %v5685_v53 }
 0x4b5   :  { %4260 = vmatpush1.bf16.msra.mxu0 %v5683_v54 }
 0x4b6   :  { %4261 = vmatprep.subr.bf16.mxu0 %v5688_v55 }
 0x4b9   :  { %4262 = vmatpush1.bf16.msra.mxu0 %v5686_v56 }
 0x4ba   :  { %4263 = vmatprep.subr.bf16.mxu0 %v5691_v58 }
 0x4bd   :  { %4264 = vmatpush1.bf16.msra.mxu0 %v5689_v61 }
 0x4be   :  { %4265 = vmatprep.subr.bf16.mxu0 %v5694_v62 }
 0x4c1   :  { %4266 = vmatpush1.bf16.msra.mxu0 %v5692_v1 }
 0x4c2   :  { %4267 = vmatprep.subr.bf16.mxu0 %v5697_v21 }
 0x4c5   :  { %4268 = vmatpush1.bf16.msra.mxu0 %v5695_v37 }
 0x4c6   :  { %4269 = vmatprep.subr.bf16.mxu0 %v5700_v4 }
 0x4c9   :  { %4270 = vmatpush1.bf16.msra.mxu0 %v5698_v5 }
 0x4ca   :  { %4271 = vmatprep.subr.bf16.mxu0 %v5703_v6 }
 0x4cd   :  { %4272 = vmatpush1.bf16.msra.mxu0 %v5701_v7 }
 0x4ce   :  { %4273 = vmatprep.subr.bf16.mxu0 %v5706_v10 }
 0x4d1   :  { %4274 = vmatpush1.bf16.msra.mxu0 %v5704_v11 }
 0x4d2   :  { %4275 = vmatprep.subr.bf16.mxu0 %v5709_v13 }
 0x4d5   :  { %4276 = vmatpush1.bf16.msra.mxu0 %v5707_v14 }
 0x4d6   :  { %4277 = vmatprep.subr.bf16.mxu0 %v5712_v17 }
 0x4d9   :  { %4278 = vmatpush1.bf16.msra.mxu0 %v5710_v19 }
 0x4da   :  { %4279 = vmatprep.subr.bf16.mxu0 %v5715_v20 }
 0x4dd   :  { %4280 = vmatpush1.bf16.msra.mxu0 %v5713_v23 }
 0x4de   :  { %4281 = vmatprep.subr.bf16.mxu0 %v5718_v22 }
 0x4e1   :  { %4282 = vmatpush1.bf16.msra.mxu0 %v5716_v18 }
 0x4e4   :  { %4284 = vmatmul.mubr.bf16.vlgmr.msra.gmra.mrb[24].mxu0 %v3812_v27 }
 0x5b7   :  { %v4285_v63 = vpop.f32.mrb[24].mxu0 }
 0x5b8   :  { %v4893_v33 = vadd.f32 %v4285_v63, %v3883_v29  ;;  %v4287_v34 = vpop.f32.mrb[25].mxu0 }
 0x5b9   :  { %v4894_v59 = vadd.f32 %v4287_v34, %v3887_v31  ;;  %v4289_v9 = vpop.f32.mrb[26].mxu0 }
 0x5ba   :  { %v4309_v35 = vmul.f32 %v4893_v33, %v4893_v33  ;;  %v4290_v36 = vpop.f32.mrb[27].mxu0 }
 0x5bb   :  { %v4292_v28 = vmul.f32 0.5, %v4894_v59  ;;  %v4308_v38 = vadd.f32 1.0, %v4894_v59 }
 0x5bd   :  { %v4293_v8 = vmul.f32 1.442695, %v4292_v28  ;;  %v4310_v2 = vsub.f32 %v4308_v38, %v4309_v35 }
 0x5bf   :  { %5719 = vpow2.f32 %v4293_v8 }
 0x5c9   :  { %v5720_v40 = vpop.eup %5719 }
 0x5ca   :  { %v4299_v39 = vmul.f32 %v5720_v40, %v5720_v40  ;;  %v4296_v57 = vmul.f32 %v5720_v40, %v4295_v32 }
 0x5cc   :  { %v4311_v41 = vsub.f32 %v4310_v2, %v4299_v39  ;;  %v4297_v60 = vadd.f32 %v4893_v33, %v4296_v57 }
 0x5ce   :  { %v4313_v25 = vrot.slane %v4311_v41, 4  ;;  %4298 = vst [vmem:[#allocation19] sm:$0xff] %v4297_v60 }
 0x5cf   :  { %5952 = shalt.err (!%p5949_p0)
}
 0x5d0   :  { %s5953_s6 = scalar_lea.hbm %s6400_s14, 128 }
 0x5d1   :  { %p5954_p1 = scmp.ne.s32.totalorder %s6400_s14, %s5953_s6  ;;  %p5957_p2 = scmp.lt.u32.totalorder %s5953_s6, %s6400_s14 }
 0x5d3   :  { %p5959_p3 = pnand %p5957_p2, %p5954_p1 }
 0x5d5   :  { %5962 = shalt.err (!%p5959_p3)
}
 0x5d6   :  { %4329 = dma.vmem_to_hbm [thread:$0]  %s4327_s13, 128, %s6400_s14, [#allocation4]   ;;  %v4314_v42 = vadd.f32 %v4313_v25, %v4311_v41 }
 0x5d7   :  { %s6017_s17 = smov [#allocation20]  }
 0x5d8   :  { %v4315_v43 = vrot.slane %v4314_v42, 2  ;;  %s4336_s8 = sshll.u32 %s6017_s17, 4  ;;  %s4337_s8 = int_to_ptr.vmem [resolvable:$true] %s4336_s8 }
 0x5d9   :  { %s5963_s4 = scalar_lea.vmem %s4337_s8, 16  ;;  %s5967_s5 = scalar_lea.vmem %s4337_s8, 32 }
 0x5da   :  { %v4316_v44 = vadd.f32 %v4315_v43, %v4314_v42  ;;  %p5964_p4 = scmp.ne.s32.totalorder %s4337_s8, %s5963_s4  ;;  %p5968_p5 = scmp.lt.s32.totalorder %s4337_s8, %s4337_s8 }
 0x5db   :  { %p5969_p6 = scmp.lt.s32.totalorder %s5967_s5, %s5963_s4 }
 0x5dc   :  { %v4317_v45 = vrot.slane %v4316_v44, 1 }
 0x5dd   :  { %p5970_p7 = por %p5969_p6, %p5968_p5 }
 0x5de   :  { %v4318_v46 = vadd.f32 %v4317_v45, %v4316_v44 }
 0x5df   :  { %p5971_p8 = pnand %p5970_p7, %p5964_p4 }
 0x5e0   :  { %4319 = vst [vmem:[#allocation20] sm:$0x1] %v4318_v46 }
 0x5e1   :  { %5974 = shalt.err (!%p5971_p8)
}
 0x5e2   :  { %s5975_s14 = scalar_lea.hbm %s6401_s15, 16 }
 0x5e3   :  { %p5976_p9 = scmp.ne.s32.totalorder %s6401_s15, %s5975_s14  ;;  %p5979_p10 = scmp.lt.u32.totalorder %s5975_s14, %s6401_s15 }
 0x5e5   :  { %p5981_p11 = pnand %p5979_p10, %p5976_p9 }
 0x5e7   :  { %5984 = shalt.err (!%p5981_p11)
}
 0x5e8   :  { %4339 = dma.vmem_to_hbm [thread:$0]  %s4337_s8, 16, %s6401_s15, [#allocation21]  }
 0x5e9   :  { %5997 = dma.done.wait [#allocation4], 128  }
 0x5ea   :  { %5998 = vsyncadd [#allocation4], 4294967168 }
 0x5eb   :  { %5999 = dma.done.wait [#allocation21], 16  }
 0x5ec   :  { %6000 = vsyncadd [#allocation21], 4294967280 }
 0x5ed   :  { %4346 = vsyncpa [#allocation3], 1 }
 0x5ee   :  { %4347 = vsyncpa [#allocation6], 1 }
 0x5ef   :  { %4348 = vsyncpa [#allocation9], 1 }
 0x5f0   :  { %4349 = vsyncpa [#allocation12], 1 }
 0x5f1   :  { %4350 = vsyncpa [#allocation15], 1 }
 0x5f2   :  { %4351 = vsyncpa [#allocation18], 1 }
 0x5f3   :  { %4352 = vsyncpa [#allocation4], 1 }
 0x5f4   :  { %4353 = vsyncpa [#allocation21], 1 }

</bundles_post_ra>
